<compile_context>
chip_gen: v7x
topology: tpu7x:2x2x1
jax: 0.10.0
libtpu: 0.0.40
codegen_flags: <defaults>
</compile_context>

<pallas_src>
import numpy as np
import jax
import jax.numpy as jnp
from jax.experimental import pallas as pl
from jax.experimental.pallas import tpu as pltpu


def _round_up(x: int, m: int) -> int:
    return ((x + m - 1) // m) * m


# ----------------------------------------------------------------------------
# Gaussian kernel construction (host-side glue; equivalent of
# create_Gaussian_kernel_2D + HybridImageModel.get_kernel).
# ----------------------------------------------------------------------------
def create_gaussian_kernel_1d(cutoff_frequency: int) -> np.ndarray:
    k = int(cutoff_frequency) * 4 + 1
    sigma = float(cutoff_frequency)
    mean = k // 2
    idx = np.arange(k, dtype=np.float64)
    g1d = np.exp(-((idx - mean) ** 2) / (2.0 * sigma ** 2))
    g1d /= g1d.sum()
    return g1d.astype(np.float32)


def create_gaussian_kernel_2d(cutoff_frequency: int) -> np.ndarray:
    g1d = create_gaussian_kernel_1d(cutoff_frequency).astype(np.float64)
    g2d = np.outer(g1d, g1d)
    g2d /= g2d.sum()
    return g2d.astype(np.float32)


def build_gaussian_factors(cutoff_frequencies):
    """(B, K) per-image 1D Gaussian factors, each centered in a length-K vector
    (zeros outside).  Embedding a smaller k_i kernel centered in max-K with the
    common padding P = K//2 is mathematically identical to per-image conv2d
    with padding k_i//2 (cross-correlation, exactly what F.conv2d computes)."""
    # NOTE: like PyTorch's `.item()`, cutoff frequencies must be concrete host
    # values since they determine kernel (and padding) shapes.
    cutoffs = [int(c) for c in np.asarray(cutoff_frequencies)]
    ks = [4 * c + 1 for c in cutoffs]
    K = max(ks)
    g1 = np.zeros((len(cutoffs), K), np.float32)
    for i, c in enumerate(cutoffs):
        g = create_gaussian_kernel_1d(c)
        off = (K - g.shape[0]) // 2
        g1[i, off:off + g.shape[0]] = g
    return g1, K


# ----------------------------------------------------------------------------
# Per-image banded operators (tiny wrapper-side XLA ops, fetched once/image).
# ----------------------------------------------------------------------------
def _band_from_taps(g1: jax.Array, offsets: np.ndarray, extra_valid=None):
    """(B, *offsets.shape) matrix with entry = g1[b, offsets[...]] where the
    offset is a valid tap index (and extra_valid holds), else 0."""
    B, K = g1.shape
    valid = (offsets >= 0) & (offsets < K)
    if extra_valid is not None:
        valid = valid & extra_valid
    idx = jnp.asarray(np.clip(offsets, 0, K - 1).reshape(-1))
    w = jnp.take(g1, idx, axis=1).reshape((B,) + offsets.shape)
    return jnp.where(jnp.asarray(valid)[None], w, 0.0).astype(jnp.float32)


# ----------------------------------------------------------------------------
# Pallas kernel: one grid step = one H-strip of one image (all C channels).
# ----------------------------------------------------------------------------
def make_hybrid_kernel(C: int, P: int):
    def kernel(top_ref, bot_ref, tva_ref, tvb_ref, th_ref,
               low_ref, high_ref, hyb_ref):
        # Per-image operators (constant block index across strips).
        tva = tva_ref[...]                       # (TH, TH) upper vertical band
        tvb = tvb_ref[...]                       # (TH, TH) lower vertical band
        th = th_ref[...]                         # (Wl, Wl) horizontal band

        for c in range(C):
            # Channels [0, C) = image1, [C, 2C) = image2 (stacked on channels).
            i1_top, i1_bot = top_ref[c], bot_ref[c]
            i2_top, i2_bot = top_ref[C + c], bot_ref[C + c]

            # Vertical K-tap pass: two (TH, TH) MXU matmuls over the halo window.
            tmp1 = (jnp.dot(tva, i1_top, preferred_element_type=jnp.float32)
                    + jnp.dot(tvb, i1_bot, preferred_element_type=jnp.float32))
            tmp2 = (jnp.dot(tva, i2_top, preferred_element_type=jnp.float32)
                    + jnp.dot(tvb, i2_bot, preferred_element_type=jnp.float32))

            # Horizontal K-tap pass: one (TH, Wl) x (Wl, Wl) MXU matmul.  The
            # band already maps padded columns -> lane-dense output columns,
            # so the result is stored full-width (no masked stores, no slice).
            low1 = jnp.dot(tmp1, th, preferred_element_type=jnp.float32)
            low2 = jnp.dot(tmp2, th, preferred_element_type=jnp.float32)

            # Unpadded image2 rows of this strip live at window rows [P, P+TH).
            if P > 0:
                img2 = jnp.concatenate([i2_top[P:, :], i2_bot[:P, :]], axis=0)
            else:
                img2 = i2_top

            high = img2 - low2                   # high-pass: no clamp (spec)
            low_ref[c] = jnp.clip(low1, 0.0, 1.0)
            high_ref[c] = high
            hyb_ref[c] = jnp.clip(low1 + high, 0.0, 1.0)

    return kernel


def hybrid_image_pallas(image1: jax.Array, image2: jax.Array, g1,
                        *, strip_height: int | None = None):
    """image1, image2: (B, C, H, W) float32.  g1: (B, K) 1D Gaussian factors."""
    B, C, H, W = image1.shape
    g1 = jnp.asarray(g1, jnp.float32)
    assert g1.shape[0] == B
    K = int(g1.shape[1])
    P = K // 2

    Wl = _round_up(W, 128)                       # lane-dense input & output width

    # ---- generation-aware VMEM budget & strip height ------------------------
    try:
        vmem_cap = int(pltpu.get_tpu_info().vmem_capacity_bytes)
    except Exception:  # pragma: no cover - conservative fallback (v7x per-TC)
        vmem_cap = 64 * 1024 * 1024

    def _step_bytes(th):
        blk_in = 2 * 2 * (2 * C * th * Wl)       # two halo blocks, double-buffered
        blk_out = 2 * 3 * (C * th * Wl)          # three outputs, double-buffered
        blk_ops = 2 * (Wl * Wl + 2 * th * th)    # band operators
        temps = 10 * th * Wl                     # live per-channel temporaries
        return 4 * (blk_in + blk_out + blk_ops + temps)

    th_min = _round_up(max(2 * P, 8), 8)         # halo trick requires TH >= 2P
    if strip_height is None:
        TH = min(_round_up(H, 8), 256)
    else:
        TH = _round_up(int(strip_height), 8)
    TH = max(TH, th_min)
    while TH > th_min and _step_bytes(TH) > int(0.45 * vmem_cap):
        TH = max(th_min, _round_up(TH // 2, 8))

    NSH = -(-H // TH)                            # number of output row strips
    Hout = NSH * TH                              # sublane-dense padded output rows
    HP = (NSH + 1) * TH                          # padded input rows (extra halo block)

    # ---- stage inputs: stack the two images on channels, pad once -----------
    #   rows:  P zeros on top (the conv 'same' padding), zeros below up to HP
    #   width: right-pad to Wl (pure lane alignment; conv padding is folded
    #          into the horizontal band operator, so no +/-P width pad needed)
    x = jnp.concatenate([image1.astype(jnp.float32),
                         image2.astype(jnp.float32)], axis=1)
    x = jnp.pad(x, ((0, 0), (0, 0), (P, HP - H - P), (0, Wl - W)))

    # ---- per-image banded operators -----------------------------------------
    yy = np.arange(TH)[:, None]
    ll = np.arange(TH)[None, :]
    tva = _band_from_taps(g1, ll - yy)            # window rows [0, TH)
    tvb = _band_from_taps(g1, ll + TH - yy)       # window rows [TH, 2*TH)
    jj = np.arange(Wl)[:, None]
    xx = np.arange(Wl)[None, :]
    th_op = _band_from_taps(g1, jj - xx + P,
                            extra_valid=(jj < W) & (xx < W))

    # ---- BlockSpecs ----------------------------------------------------------
    def _win_spec(shift):
        return pl.BlockSpec((None, 2 * C, TH, Wl),
                            lambda b, i, shift=shift: (b, 0, i + shift, 0))

    def _op_spec(rows, cols):
        return pl.BlockSpec((None, rows, cols), lambda b, i: (b, 0, 0))

    out_specs = [pl.BlockSpec((None, C, TH, Wl), lambda b, i: (b, 0, i, 0))
                 for _ in range(3)]

    grid_spec = pltpu.PrefetchScalarGridSpec(
        num_scalar_prefetch=0,
        grid=(B, NSH),
        in_specs=[
            _win_spec(0),            # strip window, upper block (rows i*TH ..)
            _win_spec(1),            # strip window, lower halo block
            _op_spec(TH, TH),        # vertical band, upper half
            _op_spec(TH, TH),        # vertical band, lower half
            _op_spec(Wl, Wl),        # horizontal band (lane-dense outputs)
        ],
        out_specs=out_specs,
    )

    est = _step_bytes(TH)
    vmem_limit = int(min(max(2 * est, 32 * 1024 * 1024), (vmem_cap * 7) // 8))

    out_struct = jax.ShapeDtypeStruct((B, C, Hout, Wl), jnp.float32)
    low, high, hyb = pl.pallas_call(
        make_hybrid_kernel(C, P),
        out_shape=[out_struct, out_struct, out_struct],
        grid_spec=grid_spec,
        compiler_params=pltpu.CompilerParams(
            dimension_semantics=("parallel", "parallel"),
            vmem_limit_bytes=vmem_limit),
    )(x, x, tva, tvb, th_op)

    # Drop the alignment padding added for lane/sublane-dense stores.
    return (low[:, :, :H, :W], high[:, :, :H, :W], hyb[:, :, :H, :W])


# ----------------------------------------------------------------------------
# Pure-JAX reference (per-image exact kernel size + padding, like the module).
# ----------------------------------------------------------------------------
def hybrid_image_ref(image1, image2, cutoff_frequencies):
    B, C, H, W = image1.shape
    lows, highs, hybs = [], [], []
    for i in range(B):
        g2d = create_gaussian_kernel_2d(int(cutoff_frequencies[i]))
        k = g2d.shape[0]
        p = k // 2
        kern = jnp.tile(jnp.asarray(g2d)[None, None], (C, 1, 1, 1))  # (C,1,k,k)

        def conv(xch, kern=kern, p=p):
            return jax.lax.conv_general_dilated(
                xch[None], kern, (1, 1), [(p, p), (p, p)],
                dimension_numbers=("NCHW", "OIHW", "NCHW"),
                feature_group_count=C,
                precision=jax.lax.Precision.HIGHEST)[0]

        low1 = conv(image1[i])
        low2 = conv(image2[i])
        high = image2[i] - low2
        lows.append(low1)
        highs.append(high)
        hybs.append(low1 + high)
    low = jnp.clip(jnp.stack(lows), 0.0, 1.0)
    high = jnp.stack(highs)
    hyb = jnp.clip(jnp.stack(hybs), 0.0, 1.0)
    return low, high, hyb


if __name__ == "__main__":
    key = jax.random.PRNGKey(0)

    def run_case(B, C, H, W, cutoffs, strip_height=None, case=0, atol=5e-3):
        # atol is loose enough to tolerate MXU f32 multi-pass rounding but far
        # below any indexing/layout bug (those show up at >= 5e-2).
        k1, k2 = jax.random.split(jax.random.fold_in(key, case))
        image1 = jax.random.uniform(k1, (B, C, H, W), dtype=jnp.float32)
        image2 = jax.random.uniform(k2, (B, C, H, W), dtype=jnp.float32)
        g1_np, _ = build_gaussian_factors(cutoffs)
        low, high, hyb = hybrid_image_pallas(image1, image2, g1_np,
                                             strip_height=strip_height)
        jax.block_until_ready((low, high, hyb))
        low_r, high_r, hyb_r = hybrid_image_ref(image1, image2, cutoffs)
        np.testing.assert_allclose(np.asarray(low), np.asarray(low_r), atol=atol)
        np.testing.assert_allclose(np.asarray(high), np.asarray(high_r), atol=atol)
        np.testing.assert_allclose(np.asarray(hyb), np.asarray(hyb_r), atol=atol)

    # Primary small case matching the module's expected input layout.
    run_case(2, 4, 16, 16, np.array([1, 2], np.int32), case=0)
    # Stress the new structure: W not a multiple of 128, H not a multiple of
    # the strip height (multi-strip halo path), mixed very-different cutoffs,
    # and 2P == TH (tight halo bound).
    run_case(2, 3, 40, 33, np.array([1, 4], np.int32), strip_height=16, case=1)

    print("KERNEL_OK")
</pallas_src>

<mosaic_0001>
module attributes {stable_mosaic.version = 11 : i64} {
  func.func @kernel(%arg0: i32, %arg1: i32, %arg2: memref<1x8x16x128xf32, #tpu.memory_space<vmem>>, %arg3: memref<1x8x16x128xf32, #tpu.memory_space<vmem>>, %arg4: memref<1x16x16xf32, #tpu.memory_space<vmem>>, %arg5: memref<1x16x16xf32, #tpu.memory_space<vmem>>, %arg6: memref<1x128x128xf32, #tpu.memory_space<vmem>>, %arg7: memref<1x4x16x128xf32, #tpu.memory_space<vmem>>, %arg8: memref<1x4x16x128xf32, #tpu.memory_space<vmem>>, %arg9: memref<1x4x16x128xf32, #tpu.memory_space<vmem>>) attributes {dimension_semantics = [#tpu.dimension_semantics<parallel>, #tpu.dimension_semantics<parallel>], iteration_bounds = array<i64: 2, 1>, scalar_prefetch = 0 : i64, scratch_operands = 0 : i64, tpu.core_type = #tpu.core_type<tc>, window_params = [{transform_indices = @transform_0, window_bounds = array<i64: 1, 8, 16, 128>}, {transform_indices = @transform_1, window_bounds = array<i64: 1, 8, 16, 128>}, {transform_indices = @transform_2, window_bounds = array<i64: 1, 16, 16>}, {transform_indices = @transform_3, window_bounds = array<i64: 1, 16, 16>}, {transform_indices = @transform_4, window_bounds = array<i64: 1, 128, 128>}, {transform_indices = @transform_5, window_bounds = array<i64: 1, 4, 16, 128>}, {transform_indices = @transform_6, window_bounds = array<i64: 1, 4, 16, 128>}, {transform_indices = @transform_7, window_bounds = array<i64: 1, 4, 16, 128>}]} {
    %c0 = arith.constant 0 : index
    %c0_0 = arith.constant 0 : index
    %c0_1 = arith.constant 0 : index
    %0 = vector.load %arg4[%c0, %c0_0, %c0_1] : memref<1x16x16xf32, #tpu.memory_space<vmem>>, vector<1x16x16xf32>
    %1 = vector.shape_cast %0 : vector<1x16x16xf32> to vector<16x16xf32>
    %c0_2 = arith.constant 0 : index
    %c0_3 = arith.constant 0 : index
    %c0_4 = arith.constant 0 : index
    %2 = vector.load %arg5[%c0_2, %c0_3, %c0_4] : memref<1x16x16xf32, #tpu.memory_space<vmem>>, vector<1x16x16xf32>
    %3 = vector.shape_cast %2 : vector<1x16x16xf32> to vector<16x16xf32>
    %c0_5 = arith.constant 0 : index
    %c0_6 = arith.constant 0 : index
    %c0_7 = arith.constant 0 : index
    %4 = vector.load %arg6[%c0_5, %c0_6, %c0_7] : memref<1x128x128xf32, #tpu.memory_space<vmem>>, vector<1x128x128xf32>
    %5 = vector.shape_cast %4 : vector<1x128x128xf32> to vector<128x128xf32>
    %c0_8 = arith.constant 0 : index
    %c0_9 = arith.constant 0 : index
    %c0_10 = arith.constant 0 : index
    %c0_11 = arith.constant 0 : index
    %6 = vector.load %arg2[%c0_8, %c0_9, %c0_10, %c0_11] : memref<1x8x16x128xf32, #tpu.memory_space<vmem>>, vector<1x1x16x128xf32>
    %7 = vector.shape_cast %6 : vector<1x1x16x128xf32> to vector<16x128xf32>
    %c0_12 = arith.constant 0 : index
    %c0_13 = arith.constant 0 : index
    %c0_14 = arith.constant 0 : index
    %c0_15 = arith.constant 0 : index
    %8 = vector.load %arg3[%c0_12, %c0_13, %c0_14, %c0_15] : memref<1x8x16x128xf32, #tpu.memory_space<vmem>>, vector<1x1x16x128xf32>
    %9 = vector.shape_cast %8 : vector<1x1x16x128xf32> to vector<16x128xf32>
    %c0_16 = arith.constant 0 : index
    %c4 = arith.constant 4 : index
    %c0_17 = arith.constant 0 : index
    %c0_18 = arith.constant 0 : index
    %10 = vector.load %arg2[%c0_16, %c4, %c0_17, %c0_18] : memref<1x8x16x128xf32, #tpu.memory_space<vmem>>, vector<1x1x16x128xf32>
    %11 = vector.shape_cast %10 : vector<1x1x16x128xf32> to vector<16x128xf32>
    %c0_19 = arith.constant 0 : index
    %c4_20 = arith.constant 4 : index
    %c0_21 = arith.constant 0 : index
    %c0_22 = arith.constant 0 : index
    %12 = vector.load %arg3[%c0_19, %c4_20, %c0_21, %c0_22] : memref<1x8x16x128xf32, #tpu.memory_space<vmem>>, vector<1x1x16x128xf32>
    %13 = vector.shape_cast %12 : vector<1x1x16x128xf32> to vector<16x128xf32>
    %cst = arith.constant dense<0.000000e+00> : vector<16x128xf32>
    %14 = tpu.matmul %1, %7, %cst {dimension_numbers = #tpu.dot_dimension_numbers<[1], [0], [0], [1], [0, 0, 1, 1], [], []>} : vector<16x16xf32>, vector<16x128xf32>, vector<16x128xf32> -> vector<16x128xf32>
    %cst_23 = arith.constant dense<0.000000e+00> : vector<16x128xf32>
    %15 = tpu.matmul %3, %9, %cst_23 {dimension_numbers = #tpu.dot_dimension_numbers<[1], [0], [0], [1], [0, 0, 1, 1], [], []>} : vector<16x16xf32>, vector<16x128xf32>, vector<16x128xf32> -> vector<16x128xf32>
    %16 = arith.addf %14, %15 : vector<16x128xf32>
    %cst_24 = arith.constant dense<0.000000e+00> : vector<16x128xf32>
    %17 = tpu.matmul %1, %11, %cst_24 {dimension_numbers = #tpu.dot_dimension_numbers<[1], [0], [0], [1], [0, 0, 1, 1], [], []>} : vector<16x16xf32>, vector<16x128xf32>, vector<16x128xf32> -> vector<16x128xf32>
    %cst_25 = arith.constant dense<0.000000e+00> : vector<16x128xf32>
    %18 = tpu.matmul %3, %13, %cst_25 {dimension_numbers = #tpu.dot_dimension_numbers<[1], [0], [0], [1], [0, 0, 1, 1], [], []>} : vector<16x16xf32>, vector<16x128xf32>, vector<16x128xf32> -> vector<16x128xf32>
    %19 = arith.addf %17, %18 : vector<16x128xf32>
    %cst_26 = arith.constant dense<0.000000e+00> : vector<16x128xf32>
    %20 = tpu.matmul %16, %5, %cst_26 {dimension_numbers = #tpu.dot_dimension_numbers<[1], [0], [0], [1], [0, 0, 1, 1], [], []>} : vector<16x128xf32>, vector<128x128xf32>, vector<16x128xf32> -> vector<16x128xf32>
    %cst_27 = arith.constant dense<0.000000e+00> : vector<16x128xf32>
    %21 = tpu.matmul %19, %5, %cst_27 {dimension_numbers = #tpu.dot_dimension_numbers<[1], [0], [0], [1], [0, 0, 1, 1], [], []>} : vector<16x128xf32>, vector<128x128xf32>, vector<16x128xf32> -> vector<16x128xf32>
    %22 = vector.extract_strided_slice %11 {offsets = [4, 0], sizes = [12, 128], strides = [1, 1]} : vector<16x128xf32> to vector<12x128xf32>
    %23 = vector.extract_strided_slice %13 {offsets = [0, 0], sizes = [4, 128], strides = [1, 1]} : vector<16x128xf32> to vector<4x128xf32>
    %24 = tpu.concatenate %22, %23 in 0 : vector<12x128xf32>, vector<4x128xf32> -> vector<16x128xf32>
    %25 = arith.subf %24, %21 : vector<16x128xf32>
    %cst_28 = arith.constant 0.000000e+00 : f32
    %cst_29 = arith.constant 1.000000e+00 : f32
    %26 = vector.broadcast %cst_28 : f32 to vector<16x128xf32>
    %27 = arith.maximumf %26, %20 : vector<16x128xf32>
    %28 = vector.broadcast %cst_29 : f32 to vector<16x128xf32>
    %29 = arith.minimumf %28, %27 : vector<16x128xf32>
    %c0_30 = arith.constant 0 : index
    %c0_31 = arith.constant 0 : index
    %c0_32 = arith.constant 0 : index
    %c0_33 = arith.constant 0 : index
    %30 = vector.load %arg7[%c0_30, %c0_31, %c0_32, %c0_33] : memref<1x4x16x128xf32, #tpu.memory_space<vmem>>, vector<1x1x16x128xf32>
    %31 = vector.shape_cast %30 : vector<1x1x16x128xf32> to vector<16x128xf32>
    %32 = vector.shape_cast %29 : vector<16x128xf32> to vector<1x1x16x128xf32>
    tpu.vector_store %arg7[%c0_30, %c0_31, %c0_32, %c0_33], %32 {strides = array<i32>} : memref<1x4x16x128xf32, #tpu.memory_space<vmem>>, vector<1x1x16x128xf32>,
    %c0_34 = arith.constant 0 : index
    %c0_35 = arith.constant 0 : index
    %c0_36 = arith.constant 0 : index
    %c0_37 = arith.constant 0 : index
    %33 = vector.load %arg8[%c0_34, %c0_35, %c0_36, %c0_37] : memref<1x4x16x128xf32, #tpu.memory_space<vmem>>, vector<1x1x16x128xf32>
    %34 = vector.shape_cast %33 : vector<1x1x16x128xf32> to vector<16x128xf32>
    %35 = vector.shape_cast %25 : vector<16x128xf32> to vector<1x1x16x128xf32>
    tpu.vector_store %arg8[%c0_34, %c0_35, %c0_36, %c0_37], %35 {strides = array<i32>} : memref<1x4x16x128xf32, #tpu.memory_space<vmem>>, vector<1x1x16x128xf32>,
    %36 = arith.addf %20, %25 : vector<16x128xf32>
    %cst_38 = arith.constant 0.000000e+00 : f32
    %cst_39 = arith.constant 1.000000e+00 : f32
    %37 = vector.broadcast %cst_38 : f32 to vector<16x128xf32>
    %38 = arith.maximumf %37, %36 : vector<16x128xf32>
    %39 = vector.broadcast %cst_39 : f32 to vector<16x128xf32>
    %40 = arith.minimumf %39, %38 : vector<16x128xf32>
    %c0_40 = arith.constant 0 : index
    %c0_41 = arith.constant 0 : index
    %c0_42 = arith.constant 0 : index
    %c0_43 = arith.constant 0 : index
    %41 = vector.load %arg9[%c0_40, %c0_41, %c0_42, %c0_43] : memref<1x4x16x128xf32, #tpu.memory_space<vmem>>, vector<1x1x16x128xf32>
    %42 = vector.shape_cast %41 : vector<1x1x16x128xf32> to vector<16x128xf32>
    %43 = vector.shape_cast %40 : vector<16x128xf32> to vector<1x1x16x128xf32>
    tpu.vector_store %arg9[%c0_40, %c0_41, %c0_42, %c0_43], %43 {strides = array<i32>} : memref<1x4x16x128xf32, #tpu.memory_space<vmem>>, vector<1x1x16x128xf32>,
    %c0_44 = arith.constant 0 : index
    %c1 = arith.constant 1 : index
    %c0_45 = arith.constant 0 : index
    %c0_46 = arith.constant 0 : index
    %44 = vector.load %arg2[%c0_44, %c1, %c0_45, %c0_46] : memref<1x8x16x128xf32, #tpu.memory_space<vmem>>, vector<1x1x16x128xf32>
    %45 = vector.shape_cast %44 : vector<1x1x16x128xf32> to vector<16x128xf32>
    %c0_47 = arith.constant 0 : index
    %c1_48 = arith.constant 1 : index
    %c0_49 = arith.constant 0 : index
    %c0_50 = arith.constant 0 : index
    %46 = vector.load %arg3[%c0_47, %c1_48, %c0_49, %c0_50] : memref<1x8x16x128xf32, #tpu.memory_space<vmem>>, vector<1x1x16x128xf32>
    %47 = vector.shape_cast %46 : vector<1x1x16x128xf32> to vector<16x128xf32>
    %c0_51 = arith.constant 0 : index
    %c5 = arith.constant 5 : index
    %c0_52 = arith.constant 0 : index
    %c0_53 = arith.constant 0 : index
    %48 = vector.load %arg2[%c0_51, %c5, %c0_52, %c0_53] : memref<1x8x16x128xf32, #tpu.memory_space<vmem>>, vector<1x1x16x128xf32>
    %49 = vector.shape_cast %48 : vector<1x1x16x128xf32> to vector<16x128xf32>
    %c0_54 = arith.constant 0 : index
    %c5_55 = arith.constant 5 : index
    %c0_56 = arith.constant 0 : index
    %c0_57 = arith.constant 0 : index
    %50 = vector.load %arg3[%c0_54, %c5_55, %c0_56, %c0_57] : memref<1x8x16x128xf32, #tpu.memory_space<vmem>>, vector<1x1x16x128xf32>
    %51 = vector.shape_cast %50 : vector<1x1x16x128xf32> to vector<16x128xf32>
    %cst_58 = arith.constant dense<0.000000e+00> : vector<16x128xf32>
    %52 = tpu.matmul %1, %45, %cst_58 {dimension_numbers = #tpu.dot_dimension_numbers<[1], [0], [0], [1], [0, 0, 1, 1], [], []>} : vector<16x16xf32>, vector<16x128xf32>, vector<16x128xf32> -> vector<16x128xf32>
    %cst_59 = arith.constant dense<0.000000e+00> : vector<16x128xf32>
    %53 = tpu.matmul %3, %47, %cst_59 {dimension_numbers = #tpu.dot_dimension_numbers<[1], [0], [0], [1], [0, 0, 1, 1], [], []>} : vector<16x16xf32>, vector<16x128xf32>, vector<16x128xf32> -> vector<16x128xf32>
    %54 = arith.addf %52, %53 : vector<16x128xf32>
    %cst_60 = arith.constant dense<0.000000e+00> : vector<16x128xf32>
    %55 = tpu.matmul %1, %49, %cst_60 {dimension_numbers = #tpu.dot_dimension_numbers<[1], [0], [0], [1], [0, 0, 1, 1], [], []>} : vector<16x16xf32>, vector<16x128xf32>, vector<16x128xf32> -> vector<16x128xf32>
    %cst_61 = arith.constant dense<0.000000e+00> : vector<16x128xf32>
    %56 = tpu.matmul %3, %51, %cst_61 {dimension_numbers = #tpu.dot_dimension_numbers<[1], [0], [0], [1], [0, 0, 1, 1], [], []>} : vector<16x16xf32>, vector<16x128xf32>, vector<16x128xf32> -> vector<16x128xf32>
    %57 = arith.addf %55, %56 : vector<16x128xf32>
    %cst_62 = arith.constant dense<0.000000e+00> : vector<16x128xf32>
    %58 = tpu.matmul %54, %5, %cst_62 {dimension_numbers = #tpu.dot_dimension_numbers<[1], [0], [0], [1], [0, 0, 1, 1], [], []>} : vector<16x128xf32>, vector<128x128xf32>, vector<16x128xf32> -> vector<16x128xf32>
    %cst_63 = arith.constant dense<0.000000e+00> : vector<16x128xf32>
    %59 = tpu.matmul %57, %5, %cst_63 {dimension_numbers = #tpu.dot_dimension_numbers<[1], [0], [0], [1], [0, 0, 1, 1], [], []>} : vector<16x128xf32>, vector<128x128xf32>, vector<16x128xf32> -> vector<16x128xf32>
    %60 = vector.extract_strided_slice %49 {offsets = [4, 0], sizes = [12, 128], strides = [1, 1]} : vector<16x128xf32> to vector<12x128xf32>
    %61 = vector.extract_strided_slice %51 {offsets = [0, 0], sizes = [4, 128], strides = [1, 1]} : vector<16x128xf32> to vector<4x128xf32>
    %62 = tpu.concatenate %60, %61 in 0 : vector<12x128xf32>, vector<4x128xf32> -> vector<16x128xf32>
    %63 = arith.subf %62, %59 : vector<16x128xf32>
    %cst_64 = arith.constant 0.000000e+00 : f32
    %cst_65 = arith.constant 1.000000e+00 : f32
    %64 = vector.broadcast %cst_64 : f32 to vector<16x128xf32>
    %65 = arith.maximumf %64, %58 : vector<16x128xf32>
    %66 = vector.broadcast %cst_65 : f32 to vector<16x128xf32>
    %67 = arith.minimumf %66, %65 : vector<16x128xf32>
    %c0_66 = arith.constant 0 : index
    %c1_67 = arith.constant 1 : index
    %c0_68 = arith.constant 0 : index
    %c0_69 = arith.constant 0 : index
    %68 = vector.load %arg7[%c0_66, %c1_67, %c0_68, %c0_69] : memref<1x4x16x128xf32, #tpu.memory_space<vmem>>, vector<1x1x16x128xf32>
    %69 = vector.shape_cast %68 : vector<1x1x16x128xf32> to vector<16x128xf32>
    %70 = vector.shape_cast %67 : vector<16x128xf32> to vector<1x1x16x128xf32>
    tpu.vector_store %arg7[%c0_66, %c1_67, %c0_68, %c0_69], %70 {strides = array<i32>} : memref<1x4x16x128xf32, #tpu.memory_space<vmem>>, vector<1x1x16x128xf32>,
    %c0_70 = arith.constant 0 : index
    %c1_71 = arith.constant 1 : index
    %c0_72 = arith.constant 0 : index
    %c0_73 = arith.constant 0 : index
    %71 = vector.load %arg8[%c0_70, %c1_71, %c0_72, %c0_73] : memref<1x4x16x128xf32, #tpu.memory_space<vmem>>, vector<1x1x16x128xf32>
    %72 = vector.shape_cast %71 : vector<1x1x16x128xf32> to vector<16x128xf32>
    %73 = vector.shape_cast %63 : vector<16x128xf32> to vector<1x1x16x128xf32>
    tpu.vector_store %arg8[%c0_70, %c1_71, %c0_72, %c0_73], %73 {strides = array<i32>} : memref<1x4x16x128xf32, #tpu.memory_space<vmem>>, vector<1x1x16x128xf32>,
    %74 = arith.addf %58, %63 : vector<16x128xf32>
    %cst_74 = arith.constant 0.000000e+00 : f32
    %cst_75 = arith.constant 1.000000e+00 : f32
    %75 = vector.broadcast %cst_74 : f32 to vector<16x128xf32>
    %76 = arith.maximumf %75, %74 : vector<16x128xf32>
    %77 = vector.broadcast %cst_75 : f32 to vector<16x128xf32>
    %78 = arith.minimumf %77, %76 : vector<16x128xf32>
    %c0_76 = arith.constant 0 : index
    %c1_77 = arith.constant 1 : index
    %c0_78 = arith.constant 0 : index
    %c0_79 = arith.constant 0 : index
    %79 = vector.load %arg9[%c0_76, %c1_77, %c0_78, %c0_79] : memref<1x4x16x128xf32, #tpu.memory_space<vmem>>, vector<1x1x16x128xf32>
    %80 = vector.shape_cast %79 : vector<1x1x16x128xf32> to vector<16x128xf32>
    %81 = vector.shape_cast %78 : vector<16x128xf32> to vector<1x1x16x128xf32>
    tpu.vector_store %arg9[%c0_76, %c1_77, %c0_78, %c0_79], %81 {strides = array<i32>} : memref<1x4x16x128xf32, #tpu.memory_space<vmem>>, vector<1x1x16x128xf32>,
    %c0_80 = arith.constant 0 : index
    %c2 = arith.constant 2 : index
    %c0_81 = arith.constant 0 : index
    %c0_82 = arith.constant 0 : index
    %82 = vector.load %arg2[%c0_80, %c2, %c0_81, %c0_82] : memref<1x8x16x128xf32, #tpu.memory_space<vmem>>, vector<1x1x16x128xf32>
    %83 = vector.shape_cast %82 : vector<1x1x16x128xf32> to vector<16x128xf32>
    %c0_83 = arith.constant 0 : index
    %c2_84 = arith.constant 2 : index
    %c0_85 = arith.constant 0 : index
    %c0_86 = arith.constant 0 : index
    %84 = vector.load %arg3[%c0_83, %c2_84, %c0_85, %c0_86] : memref<1x8x16x128xf32, #tpu.memory_space<vmem>>, vector<1x1x16x128xf32>
    %85 = vector.shape_cast %84 : vector<1x1x16x128xf32> to vector<16x128xf32>
    %c0_87 = arith.constant 0 : index
    %c6 = arith.constant 6 : index
    %c0_88 = arith.constant 0 : index
    %c0_89 = arith.constant 0 : index
    %86 = vector.load %arg2[%c0_87, %c6, %c0_88, %c0_89] : memref<1x8x16x128xf32, #tpu.memory_space<vmem>>, vector<1x1x16x128xf32>
    %87 = vector.shape_cast %86 : vector<1x1x16x128xf32> to vector<16x128xf32>
    %c0_90 = arith.constant 0 : index
    %c6_91 = arith.constant 6 : index
    %c0_92 = arith.constant 0 : index
    %c0_93 = arith.constant 0 : index
    %88 = vector.load %arg3[%c0_90, %c6_91, %c0_92, %c0_93] : memref<1x8x16x128xf32, #tpu.memory_space<vmem>>, vector<1x1x16x128xf32>
    %89 = vector.shape_cast %88 : vector<1x1x16x128xf32> to vector<16x128xf32>
    %cst_94 = arith.constant dense<0.000000e+00> : vector<16x128xf32>
    %90 = tpu.matmul %1, %83, %cst_94 {dimension_numbers = #tpu.dot_dimension_numbers<[1], [0], [0], [1], [0, 0, 1, 1], [], []>} : vector<16x16xf32>, vector<16x128xf32>, vector<16x128xf32> -> vector<16x128xf32>
    %cst_95 = arith.constant dense<0.000000e+00> : vector<16x128xf32>
    %91 = tpu.matmul %3, %85, %cst_95 {dimension_numbers = #tpu.dot_dimension_numbers<[1], [0], [0], [1], [0, 0, 1, 1], [], []>} : vector<16x16xf32>, vector<16x128xf32>, vector<16x128xf32> -> vector<16x128xf32>
    %92 = arith.addf %90, %91 : vector<16x128xf32>
    %cst_96 = arith.constant dense<0.000000e+00> : vector<16x128xf32>
    %93 = tpu.matmul %1, %87, %cst_96 {dimension_numbers = #tpu.dot_dimension_numbers<[1], [0], [0], [1], [0, 0, 1, 1], [], []>} : vector<16x16xf32>, vector<16x128xf32>, vector<16x128xf32> -> vector<16x128xf32>
    %cst_97 = arith.constant dense<0.000000e+00> : vector<16x128xf32>
    %94 = tpu.matmul %3, %89, %cst_97 {dimension_numbers = #tpu.dot_dimension_numbers<[1], [0], [0], [1], [0, 0, 1, 1], [], []>} : vector<16x16xf32>, vector<16x128xf32>, vector<16x128xf32> -> vector<16x128xf32>
    %95 = arith.addf %93, %94 : vector<16x128xf32>
    %cst_98 = arith.constant dense<0.000000e+00> : vector<16x128xf32>
    %96 = tpu.matmul %92, %5, %cst_98 {dimension_numbers = #tpu.dot_dimension_numbers<[1], [0], [0], [1], [0, 0, 1, 1], [], []>} : vector<16x128xf32>, vector<128x128xf32>, vector<16x128xf32> -> vector<16x128xf32>
    %cst_99 = arith.constant dense<0.000000e+00> : vector<16x128xf32>
    %97 = tpu.matmul %95, %5, %cst_99 {dimension_numbers = #tpu.dot_dimension_numbers<[1], [0], [0], [1], [0, 0, 1, 1], [], []>} : vector<16x128xf32>, vector<128x128xf32>, vector<16x128xf32> -> vector<16x128xf32>
    %98 = vector.extract_strided_slice %87 {offsets = [4, 0], sizes = [12, 128], strides = [1, 1]} : vector<16x128xf32> to vector<12x128xf32>
    %99 = vector.extract_strided_slice %89 {offsets = [0, 0], sizes = [4, 128], strides = [1, 1]} : vector<16x128xf32> to vector<4x128xf32>
    %100 = tpu.concatenate %98, %99 in 0 : vector<12x128xf32>, vector<4x128xf32> -> vector<16x128xf32>
    %101 = arith.subf %100, %97 : vector<16x128xf32>
    %cst_100 = arith.constant 0.000000e+00 : f32
    %cst_101 = arith.constant 1.000000e+00 : f32
    %102 = vector.broadcast %cst_100 : f32 to vector<16x128xf32>
    %103 = arith.maximumf %102, %96 : vector<16x128xf32>
    %104 = vector.broadcast %cst_101 : f32 to vector<16x128xf32>
    %105 = arith.minimumf %104, %103 : vector<16x128xf32>
    %c0_102 = arith.constant 0 : index
    %c2_103 = arith.constant 2 : index
    %c0_104 = arith.constant 0 : index
    %c0_105 = arith.constant 0 : index
    %106 = vector.load %arg7[%c0_102, %c2_103, %c0_104, %c0_105] : memref<1x4x16x128xf32, #tpu.memory_space<vmem>>, vector<1x1x16x128xf32>
    %107 = vector.shape_cast %106 : vector<1x1x16x128xf32> to vector<16x128xf32>
    %108 = vector.shape_cast %105 : vector<16x128xf32> to vector<1x1x16x128xf32>
    tpu.vector_store %arg7[%c0_102, %c2_103, %c0_104, %c0_105], %108 {strides = array<i32>} : memref<1x4x16x128xf32, #tpu.memory_space<vmem>>, vector<1x1x16x128xf32>,
    %c0_106 = arith.constant 0 : index
    %c2_107 = arith.constant 2 : index
    %c0_108 = arith.constant 0 : index
    %c0_109 = arith.constant 0 : index
    %109 = vector.load %arg8[%c0_106, %c2_107, %c0_108, %c0_109] : memref<1x4x16x128xf32, #tpu.memory_space<vmem>>, vector<1x1x16x128xf32>
    %110 = vector.shape_cast %109 : vector<1x1x16x128xf32> to vector<16x128xf32>
    %111 = vector.shape_cast %101 : vector<16x128xf32> to vector<1x1x16x128xf32>
    tpu.vector_store %arg8[%c0_106, %c2_107, %c0_108, %c0_109], %111 {strides = array<i32>} : memref<1x4x16x128xf32, #tpu.memory_space<vmem>>, vector<1x1x16x128xf32>,
    %112 = arith.addf %96, %101 : vector<16x128xf32>
    %cst_110 = arith.constant 0.000000e+00 : f32
    %cst_111 = arith.constant 1.000000e+00 : f32
    %113 = vector.broadcast %cst_110 : f32 to vector<16x128xf32>
    %114 = arith.maximumf %113, %112 : vector<16x128xf32>
    %115 = vector.broadcast %cst_111 : f32 to vector<16x128xf32>
    %116 = arith.minimumf %115, %114 : vector<16x128xf32>
    %c0_112 = arith.constant 0 : index
    %c2_113 = arith.constant 2 : index
    %c0_114 = arith.constant 0 : index
    %c0_115 = arith.constant 0 : index
    %117 = vector.load %arg9[%c0_112, %c2_113, %c0_114, %c0_115] : memref<1x4x16x128xf32, #tpu.memory_space<vmem>>, vector<1x1x16x128xf32>
    %118 = vector.shape_cast %117 : vector<1x1x16x128xf32> to vector<16x128xf32>
    %119 = vector.shape_cast %116 : vector<16x128xf32> to vector<1x1x16x128xf32>
    tpu.vector_store %arg9[%c0_112, %c2_113, %c0_114, %c0_115], %119 {strides = array<i32>} : memref<1x4x16x128xf32, #tpu.memory_space<vmem>>, vector<1x1x16x128xf32>,
    %c0_116 = arith.constant 0 : index
    %c3 = arith.constant 3 : index
    %c0_117 = arith.constant 0 : index
    %c0_118 = arith.constant 0 : index
    %120 = vector.load %arg2[%c0_116, %c3, %c0_117, %c0_118] : memref<1x8x16x128xf32, #tpu.memory_space<vmem>>, vector<1x1x16x128xf32>
    %121 = vector.shape_cast %120 : vector<1x1x16x128xf32> to vector<16x128xf32>
    %c0_119 = arith.constant 0 : index
    %c3_120 = arith.constant 3 : index
    %c0_121 = arith.constant 0 : index
    %c0_122 = arith.constant 0 : index
    %122 = vector.load %arg3[%c0_119, %c3_120, %c0_121, %c0_122] : memref<1x8x16x128xf32, #tpu.memory_space<vmem>>, vector<1x1x16x128xf32>
    %123 = vector.shape_cast %122 : vector<1x1x16x128xf32> to vector<16x128xf32>
    %c0_123 = arith.constant 0 : index
    %c7 = arith.constant 7 : index
    %c0_124 = arith.constant 0 : index
    %c0_125 = arith.constant 0 : index
    %124 = vector.load %arg2[%c0_123, %c7, %c0_124, %c0_125] : memref<1x8x16x128xf32, #tpu.memory_space<vmem>>, vector<1x1x16x128xf32>
    %125 = vector.shape_cast %124 : vector<1x1x16x128xf32> to vector<16x128xf32>
    %c0_126 = arith.constant 0 : index
    %c7_127 = arith.constant 7 : index
    %c0_128 = arith.constant 0 : index
    %c0_129 = arith.constant 0 : index
    %126 = vector.load %arg3[%c0_126, %c7_127, %c0_128, %c0_129] : memref<1x8x16x128xf32, #tpu.memory_space<vmem>>, vector<1x1x16x128xf32>
    %127 = vector.shape_cast %126 : vector<1x1x16x128xf32> to vector<16x128xf32>
    %cst_130 = arith.constant dense<0.000000e+00> : vector<16x128xf32>
    %128 = tpu.matmul %1, %121, %cst_130 {dimension_numbers = #tpu.dot_dimension_numbers<[1], [0], [0], [1], [0, 0, 1, 1], [], []>} : vector<16x16xf32>, vector<16x128xf32>, vector<16x128xf32> -> vector<16x128xf32>
    %cst_131 = arith.constant dense<0.000000e+00> : vector<16x128xf32>
    %129 = tpu.matmul %3, %123, %cst_131 {dimension_numbers = #tpu.dot_dimension_numbers<[1], [0], [0], [1], [0, 0, 1, 1], [], []>} : vector<16x16xf32>, vector<16x128xf32>, vector<16x128xf32> -> vector<16x128xf32>
    %130 = arith.addf %128, %129 : vector<16x128xf32>
    %cst_132 = arith.constant dense<0.000000e+00> : vector<16x128xf32>
    %131 = tpu.matmul %1, %125, %cst_132 {dimension_numbers = #tpu.dot_dimension_numbers<[1], [0], [0], [1], [0, 0, 1, 1], [], []>} : vector<16x16xf32>, vector<16x128xf32>, vector<16x128xf32> -> vector<16x128xf32>
    %cst_133 = arith.constant dense<0.000000e+00> : vector<16x128xf32>
    %132 = tpu.matmul %3, %127, %cst_133 {dimension_numbers = #tpu.dot_dimension_numbers<[1], [0], [0], [1], [0, 0, 1, 1], [], []>} : vector<16x16xf32>, vector<16x128xf32>, vector<16x128xf32> -> vector<16x128xf32>
    %133 = arith.addf %131, %132 : vector<16x128xf32>
    %cst_134 = arith.constant dense<0.000000e+00> : vector<16x128xf32>
    %134 = tpu.matmul %130, %5, %cst_134 {dimension_numbers = #tpu.dot_dimension_numbers<[1], [0], [0], [1], [0, 0, 1, 1], [], []>} : vector<16x128xf32>, vector<128x128xf32>, vector<16x128xf32> -> vector<16x128xf32>
    %cst_135 = arith.constant dense<0.000000e+00> : vector<16x128xf32>
    %135 = tpu.matmul %133, %5, %cst_135 {dimension_numbers = #tpu.dot_dimension_numbers<[1], [0], [0], [1], [0, 0, 1, 1], [], []>} : vector<16x128xf32>, vector<128x128xf32>, vector<16x128xf32> -> vector<16x128xf32>
    %136 = vector.extract_strided_slice %125 {offsets = [4, 0], sizes = [12, 128], strides = [1, 1]} : vector<16x128xf32> to vector<12x128xf32>
    %137 = vector.extract_strided_slice %127 {offsets = [0, 0], sizes = [4, 128], strides = [1, 1]} : vector<16x128xf32> to vector<4x128xf32>
    %138 = tpu.concatenate %136, %137 in 0 : vector<12x128xf32>, vector<4x128xf32> -> vector<16x128xf32>
    %139 = arith.subf %138, %135 : vector<16x128xf32>
    %cst_136 = arith.constant 0.000000e+00 : f32
    %cst_137 = arith.constant 1.000000e+00 : f32
    %140 = vector.broadcast %cst_136 : f32 to vector<16x128xf32>
    %141 = arith.maximumf %140, %134 : vector<16x128xf32>
    %142 = vector.broadcast %cst_137 : f32 to vector<16x128xf32>
    %143 = arith.minimumf %142, %141 : vector<16x128xf32>
    %c0_138 = arith.constant 0 : index
    %c3_139 = arith.constant 3 : index
    %c0_140 = arith.constant 0 : index
    %c0_141 = arith.constant 0 : index
    %144 = vector.load %arg7[%c0_138, %c3_139, %c0_140, %c0_141] : memref<1x4x16x128xf32, #tpu.memory_space<vmem>>, vector<1x1x16x128xf32>
    %145 = vector.shape_cast %144 : vector<1x1x16x128xf32> to vector<16x128xf32>
    %146 = vector.shape_cast %143 : vector<16x128xf32> to vector<1x1x16x128xf32>
    tpu.vector_store %arg7[%c0_138, %c3_139, %c0_140, %c0_141], %146 {strides = array<i32>} : memref<1x4x16x128xf32, #tpu.memory_space<vmem>>, vector<1x1x16x128xf32>,
    %c0_142 = arith.constant 0 : index
    %c3_143 = arith.constant 3 : index
    %c0_144 = arith.constant 0 : index
    %c0_145 = arith.constant 0 : index
    %147 = vector.load %arg8[%c0_142, %c3_143, %c0_144, %c0_145] : memref<1x4x16x128xf32, #tpu.memory_space<vmem>>, vector<1x1x16x128xf32>
    %148 = vector.shape_cast %147 : vector<1x1x16x128xf32> to vector<16x128xf32>
    %149 = vector.shape_cast %139 : vector<16x128xf32> to vector<1x1x16x128xf32>
    tpu.vector_store %arg8[%c0_142, %c3_143, %c0_144, %c0_145], %149 {strides = array<i32>} : memref<1x4x16x128xf32, #tpu.memory_space<vmem>>, vector<1x1x16x128xf32>,
    %150 = arith.addf %134, %139 : vector<16x128xf32>
    %cst_146 = arith.constant 0.000000e+00 : f32
    %cst_147 = arith.constant 1.000000e+00 : f32
    %151 = vector.broadcast %cst_146 : f32 to vector<16x128xf32>
    %152 = arith.maximumf %151, %150 : vector<16x128xf32>
    %153 = vector.broadcast %cst_147 : f32 to vector<16x128xf32>
    %154 = arith.minimumf %153, %152 : vector<16x128xf32>
    %c0_148 = arith.constant 0 : index
    %c3_149 = arith.constant 3 : index
    %c0_150 = arith.constant 0 : index
    %c0_151 = arith.constant 0 : index
    %155 = vector.load %arg9[%c0_148, %c3_149, %c0_150, %c0_151] : memref<1x4x16x128xf32, #tpu.memory_space<vmem>>, vector<1x1x16x128xf32>
    %156 = vector.shape_cast %155 : vector<1x1x16x128xf32> to vector<16x128xf32>
    %157 = vector.shape_cast %154 : vector<16x128xf32> to vector<1x1x16x128xf32>
    tpu.vector_store %arg9[%c0_148, %c3_149, %c0_150, %c0_151], %157 {strides = array<i32>} : memref<1x4x16x128xf32, #tpu.memory_space<vmem>>, vector<1x1x16x128xf32>,
    return
  }
  func.func @transform_0(%arg0: i32, %arg1: i32) -> (i32, i32, i32, i32) {
    %c0_i32 = arith.constant 0 : i32
    %0 = arith.addi %arg1, %c0_i32 : i32
    %c0_i32_0 = arith.constant 0 : i32
    %c0_i32_1 = arith.constant 0 : i32
    %c0_i32_2 = arith.constant 0 : i32
    return %arg0, %c0_i32_0, %0, %c0_i32_1 : i32, i32, i32, i32
  }
  func.func @transform_1(%arg0: i32, %arg1: i32) -> (i32, i32, i32, i32) {
    %c1_i32 = arith.constant 1 : i32
    %0 = arith.addi %arg1, %c1_i32 : i32
    %c0_i32 = arith.constant 0 : i32
    %c0_i32_0 = arith.constant 0 : i32
    %c0_i32_1 = arith.constant 0 : i32
    return %arg0, %c0_i32, %0, %c0_i32_0 : i32, i32, i32, i32
  }
  func.func @transform_2(%arg0: i32, %arg1: i32) -> (i32, i32, i32) {
    %c0_i32 = arith.constant 0 : i32
    %c0_i32_0 = arith.constant 0 : i32
    %c0_i32_1 = arith.constant 0 : i32
    return %arg0, %c0_i32, %c0_i32_0 : i32, i32, i32
  }
  func.func @transform_3(%arg0: i32, %arg1: i32) -> (i32, i32, i32) {
    %c0_i32 = arith.constant 0 : i32
    %c0_i32_0 = arith.constant 0 : i32
    %c0_i32_1 = arith.constant 0 : i32
    return %arg0, %c0_i32, %c0_i32_0 : i32, i32, i32
  }
  func.func @transform_4(%arg0: i32, %arg1: i32) -> (i32, i32, i32) {
    %c0_i32 = arith.constant 0 : i32
    %c0_i32_0 = arith.constant 0 : i32
    %c0_i32_1 = arith.constant 0 : i32
    return %arg0, %c0_i32, %c0_i32_0 : i32, i32, i32
  }
  func.func @transform_5(%arg0: i32, %arg1: i32) -> (i32, i32, i32, i32) {
    %c0_i32 = arith.constant 0 : i32
    %c0_i32_0 = arith.constant 0 : i32
    %c0_i32_1 = arith.constant 0 : i32
    return %arg0, %c0_i32, %arg1, %c0_i32_0 : i32, i32, i32, i32
  }
  func.func @transform_6(%arg0: i32, %arg1: i32) -> (i32, i32, i32, i32) {
    %c0_i32 = arith.constant 0 : i32
    %c0_i32_0 = arith.constant 0 : i32
    %c0_i32_1 = arith.constant 0 : i32
    return %arg0, %c0_i32, %arg1, %c0_i32_0 : i32, i32, i32, i32
  }
  func.func @transform_7(%arg0: i32, %arg1: i32) -> (i32, i32, i32, i32) {
    %c0_i32 = arith.constant 0 : i32
    %c0_i32_0 = arith.constant 0 : i32
    %c0_i32_1 = arith.constant 0 : i32
    return %arg0, %c0_i32, %arg1, %c0_i32_0 : i32, i32, i32, i32
  }
}

</mosaic_0001>

<bundles_post_ra>
// kernel: tpu_custom_call.1
= control target key start
LH: loop header
LB: loop body
LE: loop exit
PB: predicated region body
PF: predicated region fallthrough
CT: control target
= control target key end

     0   :  { %s5101_s0 = inlined_call_operand.hbm [shape: f32[2,8,32,128], index: 0, kind: input, shape index: {}]   ;;  %s5102_s1 = inlined_call_operand.hbm [shape: f32[2,8,32,128], index: 1, kind: input, shape index: {}]   ;;  %s5103_s2 = inlined_call_operand.hbm [shape: f32[2,16,16], index: 2, kind: input, shape index: {}]   ;;  %s5104_s3 = inlined_call_operand.hbm [shape: f32[2,16,16], index: 3, kind: input, shape index: {}]   ;;  %s5105_s4 = inlined_call_operand.hbm [shape: f32[2,128,128], index: 4, kind: input, shape index: {}]   ;;  %s5106_s5 = inlined_call_operand.hbm [shape: f32[2,4,16,128], index: 5, kind: output, shape index: {0}]   ;;  %s5107_s6 = inlined_call_operand.hbm [shape: f32[2,4,16,128], index: 6, kind: output, shape index: {1}]   ;;  %s5108_s7 = inlined_call_operand.hbm [shape: f32[2,4,16,128], index: 7, kind: output, shape index: {2}]  }
   0x1   :  { %5116 = sst [smem:[#allocation31_spill]] %s5101_s0 }
   0x2   :  { %13 = vsyncpa [#allocation3], 0 }
   0x3   :  { %15 = vsyncpa [#allocation3 + $0x1], 0 }
   0x4   :  { %16 = vsyncpa [#allocation6], 0 }
   0x5   :  { %18 = vsyncpa [#allocation6 + $0x1], 0 }
   0x6   :  { %19 = vsyncpa [#allocation9], 0 }
   0x7   :  { %21 = vsyncpa [#allocation9 + $0x1], 0 }
   0x8   :  { %22 = vsyncpa [#allocation4], 0 }
   0x9   :  { %24 = vsyncpa [#allocation4 + $0x1], 0 }
   0xa   :  { %25 = vsyncpa [#allocation13], 0 }
   0xb   :  { %27 = vsyncpa [#allocation13 + $0x1], 0  ;;  %s4333_s24 = smov 0   ;;  %s4335_s25 = smov 0  }
   0xc   :  { %s4337_s26 = smov 0   ;;  %s4339_s27 = smov 0  }
   0xd   :  { %s4341_s28 = smov 0   ;;  %s4343_s29 = smov 0  }
   0xe LB: > { %5117 = sst [smem:[#allocation26_spill]] %s4249_s24  ;;  %s4364_s30 = sadd.s32 4294967295, %s4269_s29   ;;  %s4269_s29 = sphi %s4343_s29, %s33_s29   ;;  %s4265_s28 = sphi %s4341_s28, %s5139_s28   ;;  %s4261_s27 = sphi %s4339_s27, %s5138_s27   ;;  %s4257_s26 = sphi %s4337_s26, %s5134_s26   ;;  %s4253_s25 = sphi %s4335_s25, %s5137_s25   ;;  %s4249_s24 = sphi %s4333_s24, %s5136_s24  }
   0xf   : > { %5118 = sst [smem:[#allocation27_spill]] %s4257_s26  ;;  %s5109_s8 = sadd.s32 4294967294, %s4269_s29  }
  0x10   : > { %s45_s9 = sadd.s32 1, %s4265_s28  ;;  %s54_s10 = sadd.s32 1, %s4257_s26 }
  0x11   : > { %p47_p0 = scmp.ge.s32.totalorder %s45_s9, 2  ;;  %p61_p1 = scmp.ne.s32.totalorder %s4257_s26, %s4253_s25 }
  0x12   : > { %p62_p2 = scmp.eq.s32.totalorder %s4269_s29, 0  ;;  %p67_p3 = scmp.ne.s32.totalorder %s4253_s25, %s4249_s24 }
  0x13   : > { %s5141_s9 = smov (%p47_p0, %s45_s9), 0  ;;  %p68_p5 = scmp.eq.s32.totalorder %s4364_s30, 0 }
  0x14   : > { %5119 = sst [smem:[#allocation28_spill]] %s5141_s9  ;;  %p4376_p4 = por %p62_p2, %p61_p1 }
  0x15   : > { %s49_s12 = ssub.s32 %s4265_s28, %s5141_s9  ;;  %p201_p6 = scmp.eq.s32.totalorder %s4364_s30, 1 }
  0x16   : > { %p52_p7 = scmp.eq.s32.totalorder %s49_s12, 0  ;;  %p4384_p8 = por %p68_p5, %p67_p3 }
  0x17   : > { %p4388_p9 = por %p201_p6, %p61_p1  ;;  %p207_p10 = scmp.eq.s32.totalorder %s5109_s8, 1 }
  0x18   : > { %s4395_s15 = scalar_select %p52_p7, %s4257_s26, %s54_s10  }
  0x19   : > { %s5122_s14 = scalar_select %p4388_p9, 1, 0 }
  0x1a   : > { %5123 = sst [smem:[#allocation29_spill]] %s4395_s15  ;;  %p4397_p11 = por %p207_p10, %p67_p3 }
  0x1b   : > { %p5114_p12 = scmp.ge.s32.totalorder %s4269_s29, 2 }
  0x1c   : > { %s5124_s16 = scalar_select %p4397_p11, 1, 0 }
  0x1d   : > { %279 = sbr.rel (%p5114_p12) target bundleno = 135 (0x87), region = 16 }
  0x1e   : > { %5125 = sst [smem:[#allocation30_spill]] %s5124_s16 }
  0x24   : > { %s4405_s17 = sand.u32 1, %s4257_s26   ;;  %s2986_s18 = sshll.u32 %s4265_s28, 12 }
  0x25   : > { %s4409_s19 = sshll.u32 %s4405_s17, 7  ;;  %s5126_s0 = sld [smem:[#allocation31_spill]] }
  0x26   : > { %s3930_s23 = scalar_select %p4376_p4, [#allocation0], [#allocation19] }
  0x27   : > { %s287_s10 = scalar_lea.vmem [#allocation2], %s4409_s19  ;;  %s4271_s9 = smov 512  }
  0x28   : > { %s308_s12 = sshll.u32 %s287_s10, 4  ;;  %s300_s8 = sld [smem:[%s3930_s23]]   ;;  %s309_s12 = int_to_ptr.vmem [resolvable:$true] %s308_s12 }
  0x29   : > { %3931 = sst [smem:[#allocation16]] (%p4376_p4), %s4271_s9  ;;  %s4272_s15 = smov 256  }
  0x2a   : > { %3932 = sst [smem:[#allocation16 + $0x1]] (%p4376_p4), %s4272_s15  ;;  %s4273_s26 = smov 2  }
  0x2b   : > { %s295_s22 = scalar_lea.hbm %s5126_s0, %s2986_s18  ;;  %3933 = sst [smem:[#allocation16 + $0x2]] (%p4376_p4), %s4273_s26 }
  0x2c   : > { %s4274_s20 = smov 128   ;;  %s4275_s10 = smov 8  }
  0x2d   : > { %3934 = sst [smem:[#allocation16 + $0x3]] (%p4376_p4), %s4274_s20  ;;  %s284_s0 = scalar_lea.sflag [#allocation3], %s4405_s17 }
  0x2e   : > { %3935 = sst [smem:[#allocation16 + $0x4]] (%p4376_p4), %s4274_s20  ;;  %s2872_s21 = sshll.u32 %s300_s8, 26 }
  0x2f   : > { %3936 = sst [smem:[#allocation16 + $0x5]] (%p4376_p4), %s4275_s10  ;;  %s2873_s23 = sadd.s32 134217728, %s2872_s21 }
  0x30   : > { %s4276_s16 = smov [#allocation15]  }
  0x31   : > { %3937 = dma.general (%p4376_p4), %s295_s22, 2048, %s309_s12, %s284_s0, %s4276_s16, [#allocation16], %s2873_s23, 0  }
  0x32   : > { %s331_s26 = sand.u32 1, %s4269_s29   ;;  %s2690_s8 = scalar_lea.hbm %s5102_s1, %s2986_s18 }
  0x33   : > { %s2691_s20 = scalar_lea.hbm %s2690_s8, 256  ;;  %s335_s10 = scalar_lea.vmem [#allocation5], %s4409_s19 }
  0x34   : > { %s3938_s21 = scalar_select %p4376_p4, [#allocation0], [#allocation20] }
  0x35   : > { %s357_s24 = sshll.u32 %s335_s10, 4  ;;  %s4277_s16 = smov 512   ;;  %s358_s24 = int_to_ptr.vmem [resolvable:$true] %s357_s24 }
  0x36   : > { %s349_s0 = sld [smem:[%s3938_s21]]   ;;  %s4278_s22 = smov 256  }
  0x37   : > { %3939 = sst [smem:[#allocation18]] (%p4376_p4), %s4277_s16  ;;  %s4279_s12 = smov 2  }
  0x38   : > { %3940 = sst [smem:[#allocation18 + $0x1]] (%p4376_p4), %s4278_s22  ;;  %s4280_s18 = smov 128  }
  0x39   : > { %3941 = sst [smem:[#allocation18 + $0x2]] (%p4376_p4), %s4279_s12  ;;  %s4281_s9 = smov 8  }
  0x3a   : > { %3942 = sst [smem:[#allocation18 + $0x3]] (%p4376_p4), %s4280_s18  ;;  %s4453_s8 = scalar_lea.sflag [#allocation6], %s331_s26 }
  0x3b   : > { %3943 = sst [smem:[#allocation18 + $0x4]] (%p4376_p4), %s4280_s18  ;;  %s4282_s21 = smov [#allocation17]  }
  0x3c   : > { %s2877_s23 = sshll.u32 %s349_s0, 26  ;;  %3944 = sst [smem:[#allocation18 + $0x5]] (%p4376_p4), %s4281_s9 }
  0x3d   : > { %s2878_s15 = sadd.s32 134217728, %s2877_s23  ;;  %s2879_s10 = sshll.u32 %s4405_s17, 4 }
  0x3e   : > { %3945 = dma.general (%p4376_p4), %s2691_s20, 2048, %s358_s24, %s4453_s8, %s4282_s21, [#allocation18], %s2878_s15, 0  }
  0x3f   : > { %s2988_s16 = sshll.u32 %s4265_s28, 8  ;;  %s405_s24 = scalar_lea.vmem [#allocation8], %s2879_s10 }
  0x40   : > { %s4465_s12 = scalar_lea.hbm %s5104_s3, %s2988_s16  ;;  %s412_s20 = sshll.u32 %s405_s24, 4  ;;  %s4469_s20 = int_to_ptr.vmem [resolvable:$true] %s412_s20 }
  0x41   : > { %s4473_s18 = scalar_lea.sflag [#allocation9], %s331_s26  ;;  %s4035_s23 = scalar_lea.hbm %s4465_s12, 256 }
  0x42   : > { %p4036_p13 = scmp.ne.s32.totalorder %s4465_s12, %s4035_s23  ;;  %s4039_s21 = scalar_lea.hbm %s5104_s3, 512 }
  0x43   : > { %p4040_p2 = scmp.lt.u32.totalorder %s4465_s12, %s5104_s3  ;;  %p4041_p3 = scmp.lt.u32.totalorder %s4039_s21, %s4035_s23 }
  0x44   : > { %p4037_p0 = pnand %p4036_p13, %p4376_p4  ;;  %p4043_p6 = scmp.lt.u32.totalorder %s4035_s23, %s4465_s12 }
  0x45   : > { %p4042_p5 = por %p4041_p3, %p4040_p2 }
  0x46   : > { %p4038_p1 = pneg %p4037_p0 }
  0x47   : > { %p4044_p7 = por %p4043_p6, %p4042_p5 }
  0x49   : > { %p4045_p10 = pnand %p4044_p7, %p4038_p1 }
  0x4b   : > { %4048 = shalt.err (!%p4045_p10)
}
  0x4c   : > { %s4049_s26 = scalar_lea.vmem %s4469_s20, 256  ;;  %s4283_s24 = smov [#allocation8]  }
  0x4d   : > { %p4050_p13 = scmp.ne.s32.totalorder %s4469_s20, %s4049_s26  ;;  %s4053_s9 = sshll.u32 %s4283_s24, 4  ;;  %s4054_s9 = int_to_ptr.vmem [resolvable:$false] %s4053_s9 }
  0x4e   : > { %s4055_s15 = scalar_lea.vmem %s4054_s9, 512  ;;  %p4056_p11 = scmp.lt.s32.totalorder %s4469_s20, %s4054_s9 }
  0x4f   : > { %p4051_p0 = pnand %p4050_p13, %p4376_p4  ;;  %p4057_p9 = scmp.lt.s32.totalorder %s4055_s15, %s4049_s26 }
  0x51   : > { %p4052_p12 = pneg %p4051_p0  ;;  %p4058_p2 = por %p4057_p9, %p4056_p11 }
  0x53   : > { %p4059_p3 = pnand %p4058_p2, %p4052_p12 }
  0x55   : > { %4062 = shalt.err (!%p4059_p3)
}
  0x56   : > { %s4284_s23 = smov 128   ;;  %s4285_s21 = smov 8  }
  0x57   : > { %3947 = dma.hbm_to_vmem [thread:$0]  (%p4376_p4), %s4465_s12, 256, %s4469_s20, %s4473_s18, %s4284_s23, %s4284_s23, %s4285_s21  }
  0x58   : > { %s4505_s26 = scalar_lea.hbm %s5103_s2, %s2988_s16  ;;  %s384_s24 = scalar_lea.vmem [#allocation7], %s2879_s10 }
  0x59   : > { %s391_s9 = sshll.u32 %s384_s24, 4  ;;  %s4063_s15 = scalar_lea.hbm %s4505_s26, 256  ;;  %s4509_s9 = int_to_ptr.vmem [resolvable:$true] %s391_s9 }
  0x5a   : > { %p4064_p9 = scmp.ne.s32.totalorder %s4505_s26, %s4063_s15  ;;  %s4067_s0 = scalar_lea.hbm %s5103_s2, 512 }
  0x5b   : > { %p4068_p1 = scmp.lt.u32.totalorder %s4505_s26, %s5103_s2  ;;  %p4069_p5 = scmp.lt.u32.totalorder %s4067_s0, %s4063_s15 }
  0x5c   : > { %p4065_p11 = pnand %p4064_p9, %p4376_p4  ;;  %p4071_p7 = scmp.lt.u32.totalorder %s4063_s15, %s4505_s26 }
  0x5d   : > { %p4070_p6 = por %p4069_p5, %p4068_p1 }
  0x5e   : > { %p4066_p12 = pneg %p4065_p11 }
  0x5f   : > { %p4072_p10 = por %p4071_p7, %p4070_p6 }
  0x61   : > { %p4073_p13 = pnand %p4072_p10, %p4066_p12 }
  0x63   : > { %4076 = shalt.err (!%p4073_p13)
}
  0x64   : > { %s4077_s17 = scalar_lea.vmem %s4509_s9, 256  ;;  %s4286_s10 = smov [#allocation7]  }
  0x65   : > { %p4078_p0 = scmp.ne.s32.totalorder %s4509_s9, %s4077_s17  ;;  %s4081_s24 = sshll.u32 %s4286_s10, 4  ;;  %s4082_s24 = int_to_ptr.vmem [resolvable:$false] %s4081_s24 }
  0x66   : > { %s4083_s12 = scalar_lea.vmem %s4082_s24, 512  ;;  %p4084_p9 = scmp.lt.s32.totalorder %s4509_s9, %s4082_s24 }
  0x67   : > { %p4079_p2 = pnand %p4078_p0, %p4376_p4  ;;  %p4085_p11 = scmp.lt.s32.totalorder %s4083_s12, %s4077_s17 }
  0x69   : > { %p4080_p3 = pneg %p4079_p2  ;;  %p4086_p1 = por %p4085_p11, %p4084_p9 }
  0x6b   : > { %p4087_p5 = pnand %p4086_p1, %p4080_p3 }
  0x6d   : > { %4090 = shalt.err (!%p4087_p5)
}
  0x6e   : > { %3946 = dma.hbm_to_vmem [thread:$0]  (%p4376_p4), %s4505_s26, 256, %s4509_s9, %s4453_s8, %s4284_s23, %s4284_s23, %s4285_s21  }
  0x6f   : > { %s2990_s15 = sshll.u32 %s4265_s28, 11  ;;  %s426_s20 = scalar_lea.vmem [#allocation10], %s4409_s19 }
  0x70   : > { %s433_s0 = sshll.u32 %s426_s20, 4  ;;  %s4541_s17 = scalar_lea.hbm %s5105_s4, %s2990_s15  ;;  %s4543_s0 = int_to_ptr.vmem [resolvable:$true] %s433_s0 }
  0x71   : > { %s4091_s10 = scalar_lea.hbm %s4541_s17, 2048  ;;  %s4095_s19 = scalar_lea.hbm %s5105_s4, 4096 }
  0x72   : > { %p4092_p12 = scmp.ne.s32.totalorder %s4541_s17, %s4091_s10  ;;  %p4096_p10 = scmp.lt.u32.totalorder %s4541_s17, %s5105_s4 }
  0x73   : > { %p4097_p13 = scmp.lt.u32.totalorder %s4095_s19, %s4091_s10  ;;  %p4099_p2 = scmp.lt.u32.totalorder %s4091_s10, %s4541_s17 }
  0x74   : > { %p4093_p6 = pnand %p4092_p12, %p4376_p4 }
  0x75   : > { %p4098_p0 = por %p4097_p13, %p4096_p10 }
  0x76   : > { %p4094_p7 = pneg %p4093_p6 }
  0x77   : > { %p4100_p3 = por %p4099_p2, %p4098_p0 }
  0x79   : > { %p4101_p9 = pnand %p4100_p3, %p4094_p7 }
  0x7b   : > { %4104 = shalt.err (!%p4101_p9)
}
  0x7c   : > { %s4105_s12 = scalar_lea.vmem %s4543_s0, 2048  ;;  %s4287_s15 = smov [#allocation10]  }
  0x7d   : > { %p4106_p11 = scmp.ne.s32.totalorder %s4543_s0, %s4105_s12  ;;  %s4109_s20 = sshll.u32 %s4287_s15, 4  ;;  %s4110_s20 = int_to_ptr.vmem [resolvable:$false] %s4109_s20 }
  0x7e   : > { %s4111_s16 = scalar_lea.vmem %s4110_s20, 4096  ;;  %p4112_p12 = scmp.lt.s32.totalorder %s4543_s0, %s4110_s20 }
  0x7f   : > { %p4107_p1 = pnand %p4106_p11, %p4376_p4  ;;  %p4113_p6 = scmp.lt.s32.totalorder %s4111_s16, %s4105_s12 }
  0x81   : > { %p4108_p5 = pneg %p4107_p1  ;;  %p4114_p10 = por %p4113_p6, %p4112_p12 }
  0x83   : > { %p4115_p13 = pnand %p4114_p10, %p4108_p5 }
  0x85   : > { %4118 = shalt.err (!%p4115_p13)
}
  0x86   : > { %3948 = dma.hbm_to_vmem [thread:$0]  (%p4376_p4), %s4541_s17, 2048, %s4543_s0, %s4473_s18, %s4284_s23, %s4284_s23, %s4285_s21  }
  0x87 PF: > { %p2888_p7 = scmp.ge.s32.totalorder %s4269_s29, 1  ;;  %p441_p0 = scmp.lt.s32.totalorder %s4269_s29, 3 }
  0x89   : > { %p442_p2 = pnand %p2888_p7, %p441_p0 }
  0x8a   : > { %s4573_s22 = sand.u32 (!%p442_p2), 1, %s4253_s25  }
  0x8b   : > { %445 = sbr.rel (%p442_p2) target bundleno = 1339 (0x53b), region = 40  ;;  %s4576_s11 = sshll.u32 (!%p442_p2), %s4573_s22, 7 }
  0x8c   : > { %s448_s10 = scalar_lea.sflag (!%p442_p2), [#allocation3], %s4573_s22  ;;  %s4580_s8 = scalar_lea.vmem (!%p442_p2), [#allocation2], %s4576_s11 }
  0x92   : > { %4228 = dma.done.wait (%p4384_p8), %s448_s10, 2048  }
  0x93   : > { %4230 = vsyncadd (%p4384_p8), %s448_s10, 4294965248  ;;  %s4587_s18 = sand.u32 1, %s4364_s30   ;;  %s4591_s21 = scalar_lea.vmem [#allocation5], %s4576_s11 }
  0x94   : > { %s457_s23 = scalar_lea.sflag [#allocation6], %s4587_s18 }
  0x95   : > { %4232 = dma.done.wait (%p4384_p8), %s457_s23, 2304  }
  0x96   : > { %4234 = vsyncadd (%p4384_p8), %s457_s23, 4294964992  ;;  %s2891_s0 = sshll.u32 %s4573_s22, 4  ;;  %s475_s26 = scalar_lea.sflag [#allocation9], %s4587_s18 }
  0x97   : > { %s4598_s17 = scalar_lea.vmem [#allocation7], %s2891_s0  ;;  %s478_s19 = scalar_lea.vmem [#allocation8], %s2891_s0 }
  0x98   : > { %4236 = dma.done.wait (%p4384_p8), %s475_s26, 2304  }
  0x99   : > { %4238 = vsyncadd (%p4384_p8), %s475_s26, 4294964992  ;;  %vm584_vm0 = vcmask 130048   ;;  %v576_v0 = vld [vmem:[%s4591_s21] sm:$0xff]  ;;  %v577_v1 = vld [vmem:[%s4591_s21 + $0x8] sm:$0xff]  ;;  %s4631_s30 = scalar_lea.vmem [#allocation10], %s4576_s11  ;;  %vm1049_vm1 = vcmask 1043456  }
  0x9a   : > { %v4608_v2 = vld [vmem:[%s4591_s21 + $0x40] sm:$0xff]  ;;  %v3594_v3 = vpack.c.bf16 %v577_v1, %v576_v0  ;;  %v2900_v4 = vld [vmem:[%s4591_s21 + $0x48] sm:$0xff]  ;;  %v560_v18 = vld [vmem:[%s4631_s30 + $0x10] sm:$0xff]  ;;  %s2894_s13 = sshll.u32 %s4573_s22, 6  ;;  %s4958_s16 = sshll.u32 %s4261_s27, 10 }
  0x9b   : > { %v4611_v5 = vld [vmem:[%s478_s19] sm:$0xff]  ;;  %v3602_v6 = vpack.c.bf16 %v2900_v4, %v4608_v2  ;;  %v4622_v8 = vld [vmem:[%s4580_s8 + $0x48] sm:$0xff]  ;;  %v561_v19 = vld [vmem:[%s4631_s30 + $0x18] sm:$0xff]  ;;  %v1056_v62 = vrot.slane %v4608_v2, 4  ;;  %s4793_s9 = scalar_lea.vmem [#allocation12], %s2894_s13  ;;  %s4796_s24 = scalar_lea.vmem [#allocation11], %s2894_s13 }
  0x9c   : > { %3206 = vmatprep.mubr.msk.f32.mxu0 %vm584_vm0, %v4611_v5  ;;  %3220 = vmatprep.mubr.msk.f32.mxu1 %vm584_vm0, %v4611_v5  ;;  %v4619_v7 = vld [vmem:[%s4580_s8 + $0x40] sm:$0xff]  ;;  %v575_v11 = vld [vmem:[%s4580_s8 + $0x8] sm:$0xff]  ;;  %v4655_v21 = vpack.c.bf16 %v561_v19, %v560_v18  ;;  %v564_v25 = vld [vmem:[%s4631_s30 + $0x30] sm:$0xff]  ;;  %v1051_v63 = vrot.slane %v4622_v8, 4  ;;  %s4801_s12 = scalar_lea.vmem [#allocation14], %s2894_s13  ;;  %s2585_s15 = sshll.u32 %s4796_s24, 4  ;;  %s4960_s15 = int_to_ptr.vmem [resolvable:$true] %s2585_s15 }
  0x9d   : > { %v574_v9 = vld [vmem:[%s4580_s8] sm:$0xff]  ;;  %3595 = vmatprep.subr.bf16.mxu0 %v3594_v3  ;;  %v3606_v10 = vpack.c.bf16 %v4622_v8, %v4619_v7  ;;  %3603 = vmatprep.subr.bf16.mxu1 %v3602_v6  ;;  %v4628_v12 = vld [vmem:[%s478_s19 + $0x8] sm:$0xff]  ;;  %v568_v31 = vld [vmem:[%s4631_s30 + $0x50] sm:$0xff]  ;;  %v1050_v0 = vrot.slane %v4619_v7, 4  ;;  %s2603_s20 = sshll.u32 %s4793_s9, 4  ;;  %s4968_s10 = scalar_lea.hbm %s5107_s6, %s4958_s16  ;;  %s4962_s20 = int_to_ptr.vmem [resolvable:$true] %s2603_s20 }
  0x9e   : > { %3597 = vmatpush3.bf16.msra.mxu0 %v3594_v3  ;;  %v3598_v13 = vpack.c.bf16 %v575_v11, %v574_v9  ;;  %v558_v14 = vld [vmem:[%s4631_s30] sm:$0xff]  ;;  %v559_v15 = vld [vmem:[%s4631_s30 + $0x8] sm:$0xff]  ;;  %3605 = vmatpush3.bf16.msra.mxu1 %v3602_v6  ;;  %v565_v26 = vld [vmem:[%s4631_s30 + $0x38] sm:$0xff]  ;;  %v1058_v1 = vsel %vm1049_vm1, %v1051_v63, %v1056_v62  ;;  %s2621_s0 = sshll.u32 %s4801_s12, 4  ;;  %s4119_s26 = scalar_lea.vmem %s4962_s20, 1024  ;;  %s5040_s0 = int_to_ptr.vmem [resolvable:$true] %s2621_s0 }
  0x9f   : > { %3607 = vmatprep.subr.bf16.mxu1 %v3606_v10  ;;  %v4636_v16 = vld [vmem:[%s4598_s17] sm:$0xff]  ;;  %v4638_v17 = vpack.c.bf16 %v559_v15, %v558_v14  ;;  %v4653_v20 = vld [vmem:[%s4598_s17 + $0x8] sm:$0xff]  ;;  %v4674_v27 = vpack.c.bf16 %v565_v26, %v564_v25  ;;  %v1052_v4 = vsel %vm1049_vm1, %v1050_v0, %v1051_v63  ;;  %s2565_s17 = scalar_lea.sflag [#allocation13], %s4587_s18  ;;  %p4120_p4 = scmp.ne.s32.totalorder %s4962_s20, %s4119_s26 }
  0xa0   : > { %3599 = vmatprep.subr.bf16.mxu0 %v3598_v13  ;;  %v562_v22 = vld [vmem:[%s4631_s30 + $0x20] sm:$0xff]  ;;  %v563_v23 = vld [vmem:[%s4631_s30 + $0x28] sm:$0xff]  ;;  %v569_v32 = vld [vmem:[%s4631_s30 + $0x58] sm:$0xff]  ;;  %p5127_p8 = scmp.ne.s32.totalorder %s5122_s14, 0  ;;  %s4288_s19 = smov [#allocation12]  }
  0xa1   : > { %3207 = vmatmul.mubr.msk.f32.vlgmr.msra.gmra.mrb[0].mxu0 %vm584_vm0, %v4628_v12  ;;  %3221 = vmatmul.mubr.msk.f32.vlgmr.msra.gmra.mrb[0].mxu1 %vm584_vm0, %v4628_v12  ;;  %v4666_v24 = vpack.c.bf16 %v563_v23, %v562_v22  ;;  %v566_v28 = vld [vmem:[%s4631_s30 + $0x40] sm:$0xff]  ;;  %v567_v29 = vld [vmem:[%s4631_s30 + $0x48] sm:$0xff]  ;;  %v4690_v33 = vpack.c.bf16 %v569_v32, %v568_v31  ;;  %v572_v37 = vld [vmem:[%s4631_s30 + $0x70] sm:$0xff] }
  0xa2   : > { %3601 = vmatpush3.bf16.msra.mxu0 %v3598_v13  ;;  %3609 = vmatpush3.bf16.msra.mxu1 %v3606_v10  ;;  %v4682_v30 = vpack.c.bf16 %v567_v29, %v566_v28  ;;  %v570_v34 = vld [vmem:[%s4631_s30 + $0x60] sm:$0xff]  ;;  %v571_v35 = vld [vmem:[%s4631_s30 + $0x68] sm:$0xff]  ;;  %v573_v38 = vld [vmem:[%s4631_s30 + $0x78] sm:$0xff]  ;;  %p4121_p3 = pnand %p4120_p4, %p5127_p8  ;;  %s4123_s30 = sshll.u32 %s4288_s19, 4  ;;  %s4124_s30 = int_to_ptr.vmem [resolvable:$false] %s4123_s30 }
  0xa3   : > { %3213 = vmatprep.mubr.msk.f32.mxu0 %vm584_vm0, %v4636_v16  ;;  %3227 = vmatprep.mubr.msk.f32.mxu1 %vm584_vm0, %v4636_v16  ;;  %v4698_v36 = vpack.c.bf16 %v571_v35, %v570_v34  ;;  %v4706_v39 = vpack.c.bf16 %v573_v38, %v572_v37  ;;  %v2911_v40 = vld [vmem:[%s4591_s21 + $0x10] sm:$0xff]  ;;  %v2912_v41 = vld [vmem:[%s4591_s21 + $0x18] sm:$0xff]  ;;  %v2933_v56 = vld [vmem:[%s4591_s21 + $0x20] sm:$0xff]  ;;  %s4125_s13 = scalar_lea.vmem %s4124_s30, 2048  ;;  %p4126_p11 = scmp.lt.s32.totalorder %s4962_s20, %s4124_s30 }
  0xa4   : > { %3611 = vmatprep.subr.bf16.mxu0 %v4638_v17  ;;  %3643 = vmatprep.subr.bf16.mxu1 %v4638_v17  ;;  %v4718_v42 = vld [vmem:[%s4591_s21 + $0x50] sm:$0xff]  ;;  %v3674_v43 = vpack.c.bf16 %v2912_v41, %v2911_v40  ;;  %v2916_v44 = vld [vmem:[%s4591_s21 + $0x58] sm:$0xff]  ;;  %v2934_v57 = vld [vmem:[%s4591_s21 + $0x28] sm:$0xff]  ;;  %p4122_p9 = pneg %p4121_p3  ;;  %p4127_p1 = scmp.lt.s32.totalorder %s4125_s13, %s4119_s26 }
  0xa5   : > { %v3682_v45 = vpack.c.bf16 %v2916_v44, %v4718_v42  ;;  %v4723_v46 = vld [vmem:[%s4580_s8 + $0x50] sm:$0xff]  ;;  %v4726_v47 = vld [vmem:[%s4580_s8 + $0x58] sm:$0xff]  ;;  %v4783_v58 = vld [vmem:[%s4591_s21 + $0x60] sm:$0xff]  ;;  %v3754_v59 = vpack.c.bf16 %v2934_v57, %v2933_v56 }
  0xa6   : > { %v2909_v49 = vld [vmem:[%s4580_s8 + $0x10] sm:$0xff]  ;;  %v2910_v50 = vld [vmem:[%s4580_s8 + $0x18] sm:$0xff]  ;;  %v3686_v54 = vpack.c.bf16 %v4726_v47, %v4723_v46  ;;  %v2938_v60 = vld [vmem:[%s4591_s21 + $0x68] sm:$0xff]  ;;  %p4128_p5 = por %p4127_p1, %p4126_p11 }
  0xa7   : > { %v3678_v55 = vpack.c.bf16 %v2910_v50, %v2909_v49  ;;  %v3762_v61 = vpack.c.bf16 %v2938_v60, %v4783_v58  ;;  %v4806_v26 = vld [vmem:[%s4580_s8 + $0x60] sm:$0xff]  ;;  %v4809_v28 = vld [vmem:[%s4580_s8 + $0x68] sm:$0xff]  ;;  %v2955_v41 = vld [vmem:[%s4591_s21 + $0x30] sm:$0xff]  ;;  %v1542_v50 = vrot.slane %v4726_v47, 4 }
  0xa8   : > { %v2931_v31 = vld [vmem:[%s4580_s8 + $0x20] sm:$0xff]  ;;  %v2932_v32 = vld [vmem:[%s4580_s8 + $0x28] sm:$0xff]  ;;  %v3766_v38 = vpack.c.bf16 %v4809_v28, %v4806_v26  ;;  %v4866_v44 = vld [vmem:[%s4591_s21 + $0x70] sm:$0xff]  ;;  %p4129_p12 = pnand %p4128_p5, %p4122_p9 }
  0xa9   : > { %3214 = vmatmul.mubr.msk.f32.vlgmr.msra.gmra.mrb[0].mxu0 %vm584_vm0, %v4653_v20  ;;  %3228 = vmatmul.mubr.msk.f32.vlgmr.msra.gmra.mrb[0].mxu1 %vm584_vm0, %v4653_v20  ;;  %v3758_v40 = vpack.c.bf16 %v2932_v32, %v2931_v31 }
  0xaa   : > { %3613 = vmatpush3.bf16.msra.mxu0 %v4638_v17  ;;  %3645 = vmatpush3.bf16.msra.mxu1 %v4638_v17 }
  0xab   : > { %3615 = vmatprep.subr.bf16.mxu0 %v4655_v21  ;;  %3647 = vmatprep.subr.bf16.mxu1 %v4655_v21 }
  0xae   : > { %3617 = vmatpush3.bf16.msra.mxu0 %v4655_v21  ;;  %3649 = vmatpush3.bf16.msra.mxu1 %v4655_v21 }
  0xaf   : > { %3619 = vmatprep.subr.bf16.mxu0 %v4666_v24  ;;  %3651 = vmatprep.subr.bf16.mxu1 %v4666_v24 }
  0xb2   : > { %3621 = vmatpush3.bf16.msra.mxu0 %v4666_v24  ;;  %3653 = vmatpush3.bf16.msra.mxu1 %v4666_v24 }
  0xb3   : > { %3623 = vmatprep.subr.bf16.mxu0 %v4674_v27  ;;  %3655 = vmatprep.subr.bf16.mxu1 %v4674_v27 }
  0xb6   : > { %3625 = vmatpush3.bf16.msra.mxu0 %v4674_v27  ;;  %3657 = vmatpush3.bf16.msra.mxu1 %v4674_v27 }
  0xb7   : > { %3627 = vmatprep.subr.bf16.mxu0 %v4682_v30  ;;  %3659 = vmatprep.subr.bf16.mxu1 %v4682_v30 }
  0xba   : > { %3629 = vmatpush3.bf16.msra.mxu0 %v4682_v30  ;;  %3661 = vmatpush3.bf16.msra.mxu1 %v4682_v30 }
  0xbb   : > { %3631 = vmatprep.subr.bf16.mxu0 %v4690_v33  ;;  %3663 = vmatprep.subr.bf16.mxu1 %v4690_v33 }
  0xbe   : > { %3633 = vmatpush3.bf16.msra.mxu0 %v4690_v33  ;;  %3665 = vmatpush3.bf16.msra.mxu1 %v4690_v33 }
  0xbf   : > { %3635 = vmatprep.subr.bf16.mxu0 %v4698_v36  ;;  %3667 = vmatprep.subr.bf16.mxu1 %v4698_v36 }
  0xc2   : > { %3637 = vmatpush3.bf16.msra.mxu0 %v4698_v36  ;;  %3669 = vmatpush3.bf16.msra.mxu1 %v4698_v36 }
  0xc3   : > { %3639 = vmatprep.subr.bf16.mxu0 %v4706_v39  ;;  %3671 = vmatprep.subr.bf16.mxu1 %v4706_v39 }
  0xc6   : > { %3641 = vmatpush3.bf16.msra.mxu0 %v4706_v39  ;;  %3673 = vmatpush3.bf16.msra.mxu1 %v4706_v39 }
  0xc7   : > { %3675 = vmatprep.subr.bf16.mxu0 %v3674_v43  ;;  %3683 = vmatprep.subr.bf16.mxu1 %v3682_v45 }
 0x17c   : > { %v3215_v48 = vpop.f32.mrb[0].mxu0  ;;  %v3229_v51 = vpop.f32.mrb[0].mxu1 }
 0x17d   : > { %v738_v52 = vpop.f32.mrb[1].mxu0  ;;  %v888_v53 = vpop.f32.mrb[1].mxu1 }
 0x17e   : > { %3262 = vmatprep.mubr.f32.mxu0 %v738_v52  ;;  %3297 = vmatprep.mubr.f32.mxu1 %v888_v53  ;;  %v1541_v52 = vrot.slane %v4723_v46, 4 }
 0x17f   : > { %3263 = vmatmul.mubr.f32.vlgmr.msra.gmra.mrb[2].mxu0 %v3215_v48  ;;  %3298 = vmatmul.mubr.f32.vlgmr.msra.gmra.mrb[2].mxu1 %v3229_v51  ;;  %v2960_v48 = vld [vmem:[%s4591_s21 + $0x78] sm:$0xff]  ;;  %v1547_v51 = vrot.slane %v4718_v42, 4 }
 0x180   : > { %3677 = vmatpush3.bf16.msra.mxu0 %v3674_v43  ;;  %3685 = vmatpush3.bf16.msra.mxu1 %v3682_v45  ;;  %v2956_v43 = vld [vmem:[%s4591_s21 + $0x38] sm:$0xff]  ;;  %v3842_v49 = vpack.c.bf16 %v2960_v48, %v4866_v44  ;;  %s4977_s21 = scalar_lea.hbm %s5106_s5, %s4958_s16 }
 0x181   : > { %3304 = vmatprep.mubr.msk.f32.mxu0 %vm584_vm0, %v4611_v5  ;;  %3318 = vmatprep.mubr.msk.f32.mxu1 %vm584_vm0, %v4611_v5  ;;  %v3834_v45 = vpack.c.bf16 %v2956_v43, %v2955_v41  ;;  %v1549_v53 = vsel %vm1049_vm1, %v1542_v50, %v1547_v51 }
 0x182   : > { %3687 = vmatprep.subr.bf16.mxu1 %v3686_v54  ;;  %3679 = vmatprep.subr.bf16.mxu0 %v3678_v55 }
 0x183   : > { %3305 = vmatmul.mubr.msk.f32.vlgmr.msra.gmra.mrb[4].mxu0 %vm584_vm0, %v4628_v12  ;;  %3319 = vmatmul.mubr.msk.f32.vlgmr.msra.gmra.mrb[4].mxu1 %vm584_vm0, %v4628_v12 }
 0x184   : > { %3681 = vmatpush3.bf16.msra.mxu0 %v3678_v55  ;;  %3689 = vmatpush3.bf16.msra.mxu1 %v3686_v54  ;;  %v1543_v55 = vsel %vm1049_vm1, %v1541_v52, %v1542_v50 }
 0x185   : > { %3311 = vmatprep.mubr.msk.f32.mxu0 %vm584_vm0, %v4636_v16  ;;  %3325 = vmatprep.mubr.msk.f32.mxu1 %vm584_vm0, %v4636_v16 }
 0x186   : > { %3691 = vmatprep.subr.bf16.mxu0 %v4638_v17  ;;  %3723 = vmatprep.subr.bf16.mxu1 %v4638_v17 }
 0x18b   : > { %3312 = vmatmul.mubr.msk.f32.vlgmr.msra.gmra.mrb[4].mxu0 %vm584_vm0, %v4653_v20  ;;  %3326 = vmatmul.mubr.msk.f32.vlgmr.msra.gmra.mrb[4].mxu1 %vm584_vm0, %v4653_v20 }
 0x18c   : > { %3693 = vmatpush3.bf16.msra.mxu0 %v4638_v17  ;;  %3725 = vmatpush3.bf16.msra.mxu1 %v4638_v17 }
 0x18d   : > { %3695 = vmatprep.subr.bf16.mxu0 %v4655_v21  ;;  %3727 = vmatprep.subr.bf16.mxu1 %v4655_v21 }
 0x190   : > { %3697 = vmatpush3.bf16.msra.mxu0 %v4655_v21  ;;  %3729 = vmatpush3.bf16.msra.mxu1 %v4655_v21 }
 0x191   : > { %3699 = vmatprep.subr.bf16.mxu0 %v4666_v24  ;;  %3731 = vmatprep.subr.bf16.mxu1 %v4666_v24 }
 0x194   : > { %3701 = vmatpush3.bf16.msra.mxu0 %v4666_v24  ;;  %3733 = vmatpush3.bf16.msra.mxu1 %v4666_v24 }
 0x195   : > { %3703 = vmatprep.subr.bf16.mxu0 %v4674_v27  ;;  %3735 = vmatprep.subr.bf16.mxu1 %v4674_v27 }
 0x198   : > { %3705 = vmatpush3.bf16.msra.mxu0 %v4674_v27  ;;  %3737 = vmatpush3.bf16.msra.mxu1 %v4674_v27 }
 0x199   : > { %3707 = vmatprep.subr.bf16.mxu0 %v4682_v30  ;;  %3739 = vmatprep.subr.bf16.mxu1 %v4682_v30 }
 0x19c   : > { %3709 = vmatpush3.bf16.msra.mxu0 %v4682_v30  ;;  %3741 = vmatpush3.bf16.msra.mxu1 %v4682_v30 }
 0x19d   : > { %3711 = vmatprep.subr.bf16.mxu0 %v4690_v33  ;;  %3743 = vmatprep.subr.bf16.mxu1 %v4690_v33 }
 0x1a0   : > { %3713 = vmatpush3.bf16.msra.mxu0 %v4690_v33  ;;  %3745 = vmatpush3.bf16.msra.mxu1 %v4690_v33 }
 0x1a1   : > { %3715 = vmatprep.subr.bf16.mxu0 %v4698_v36  ;;  %3747 = vmatprep.subr.bf16.mxu1 %v4698_v36 }
 0x1a4   : > { %3717 = vmatpush3.bf16.msra.mxu0 %v4698_v36  ;;  %3749 = vmatpush3.bf16.msra.mxu1 %v4698_v36 }
 0x1a5   : > { %3719 = vmatprep.subr.bf16.mxu0 %v4706_v39  ;;  %3751 = vmatprep.subr.bf16.mxu1 %v4706_v39 }
 0x1a8   : > { %3721 = vmatpush3.bf16.msra.mxu0 %v4706_v39  ;;  %3753 = vmatpush3.bf16.msra.mxu1 %v4706_v39 }
 0x1a9   : > { %3755 = vmatprep.subr.bf16.mxu0 %v3754_v59  ;;  %3763 = vmatprep.subr.bf16.mxu1 %v3762_v61 }
 0x252   : > { %v3264_v3 = vpop.f32.mrb[2].mxu0  ;;  %v3299_v9 = vpop.f32.mrb[2].mxu1 }
 0x253   : > { %v1062_v6 = vmax.f32 %v3264_v3, 0.0  ;;  %v963_v10 = vpop.f32.mrb[3].mxu0  ;;  %v1060_v11 = vsub.f32 %v1058_v1, %v3299_v9  ;;  %v1038_v14 = vpop.f32.mrb[3].mxu1  ;;  %v4882_v9 = vld [vmem:[%s4580_s8 + $0x70] sm:$0xff] }
 0x254   : > { %v1061_v13 = vmax.f32 %v963_v10, 0.0  ;;  %v1059_v18 = vsub.f32 %v1052_v4, %v1038_v14  ;;  %v2954_v14 = vld [vmem:[%s4580_s8 + $0x38] sm:$0xff]  ;;  %v2529_v41 = vrot.slane %v4882_v9, 4 }
 0x255   : > { %v1064_v15 = vmin.f32 %v1062_v6, 1.0  ;;  %1068 = vst [vmem:[%s4793_s9 + $0x8] sm:$0xff] %v1060_v11  ;;  %v1070_v2 = vadd.f32 %v3264_v3, %v1060_v11 }
 0x256   : > { %v1063_v7 = vmin.f32 %v1061_v13, 1.0  ;;  %1067 = vst [vmem:[%s4793_s9] sm:$0xff] %v1059_v18  ;;  %v1069_v8 = vadd.f32 %v1059_v18, %v963_v10  ;;  %v4885_v10 = vld [vmem:[%s4580_s8 + $0x78] sm:$0xff]  ;;  %v2953_v13 = vld [vmem:[%s4580_s8 + $0x30] sm:$0xff] }
 0x257   : > { %1066 = vst [vmem:[%s4796_s24 + $0x8] sm:$0xff] %v1064_v15  ;;  %v1072_v19 = vmax.f32 %v1070_v2, 0.0 }
 0x258   : > { %1065 = vst [vmem:[%s4796_s24] sm:$0xff] %v1063_v7  ;;  %v1071_v22 = vmax.f32 %v1069_v8, 0.0  ;;  %v3846_v7 = vpack.c.bf16 %v4885_v10, %v4882_v9  ;;  %v3838_v8 = vpack.c.bf16 %v2954_v14, %v2953_v13 }
 0x259   : > { %v1074_v23 = vmin.f32 %v1072_v19, 1.0 }
 0x25a   : > { %v1073_v25 = vmin.f32 %v1071_v22, 1.0 }
 0x25b   : > { %1076 = vst [vmem:[%s4801_s12 + $0x8] sm:$0xff] %v1074_v23 }
 0x25c   : > { %1075 = vst [vmem:[%s4801_s12] sm:$0xff] %v1073_v25 }
 0x25e   : > { %v3313_v29 = vpop.f32.mrb[4].mxu0  ;;  %v3327_v34 = vpop.f32.mrb[4].mxu1 }
 0x25f   : > { %v1230_v35 = vpop.f32.mrb[5].mxu0  ;;  %v1380_v37 = vpop.f32.mrb[5].mxu1 }
 0x260   : > { %3360 = vmatprep.mubr.f32.mxu0 %v1230_v35  ;;  %3395 = vmatprep.mubr.f32.mxu1 %v1380_v37 }
 0x261   : > { %3361 = vmatmul.mubr.f32.vlgmr.msra.gmra.mrb[6].mxu0 %v3313_v29  ;;  %3396 = vmatmul.mubr.f32.vlgmr.msra.gmra.mrb[6].mxu1 %v3327_v34 }
 0x262   : > { %3757 = vmatpush3.bf16.msra.mxu0 %v3754_v59  ;;  %3765 = vmatpush3.bf16.msra.mxu1 %v3762_v61 }
 0x263   : > { %3402 = vmatprep.mubr.msk.f32.mxu0 %vm584_vm0, %v4611_v5  ;;  %3416 = vmatprep.mubr.msk.f32.mxu1 %vm584_vm0, %v4611_v5 }
 0x264   : > { %3767 = vmatprep.subr.bf16.mxu1 %v3766_v38  ;;  %3759 = vmatprep.subr.bf16.mxu0 %v3758_v40 }
 0x265   : > { %3403 = vmatmul.mubr.msk.f32.vlgmr.msra.gmra.mrb[8].mxu0 %vm584_vm0, %v4628_v12  ;;  %3417 = vmatmul.mubr.msk.f32.vlgmr.msra.gmra.mrb[8].mxu1 %vm584_vm0, %v4628_v12 }
 0x266   : > { %3761 = vmatpush3.bf16.msra.mxu0 %v3758_v40  ;;  %3769 = vmatpush3.bf16.msra.mxu1 %v3766_v38  ;;  %v2530_v38 = vrot.slane %v4885_v10, 4  ;;  %v2535_v40 = vrot.slane %v4866_v44, 4 }
 0x267   : > { %3409 = vmatprep.mubr.msk.f32.mxu0 %vm584_vm0, %v4636_v16  ;;  %3423 = vmatprep.mubr.msk.f32.mxu1 %vm584_vm0, %v4636_v16 }
 0x268   : > { %3771 = vmatprep.subr.bf16.mxu0 %v4638_v17  ;;  %3803 = vmatprep.subr.bf16.mxu1 %v4638_v17  ;;  %v2537_v43 = vsel %vm1049_vm1, %v2530_v38, %v2535_v40  ;;  %v2531_v48 = vsel %vm1049_vm1, %v2529_v41, %v2530_v38 }
 0x26d   : > { %3410 = vmatmul.mubr.msk.f32.vlgmr.msra.gmra.mrb[8].mxu0 %vm584_vm0, %v4653_v20  ;;  %3424 = vmatmul.mubr.msk.f32.vlgmr.msra.gmra.mrb[8].mxu1 %vm584_vm0, %v4653_v20 }
 0x26e   : > { %3773 = vmatpush3.bf16.msra.mxu0 %v4638_v17  ;;  %3805 = vmatpush3.bf16.msra.mxu1 %v4638_v17 }
 0x26f   : > { %3775 = vmatprep.subr.bf16.mxu0 %v4655_v21  ;;  %3807 = vmatprep.subr.bf16.mxu1 %v4655_v21 }
 0x272   : > { %3777 = vmatpush3.bf16.msra.mxu0 %v4655_v21  ;;  %3809 = vmatpush3.bf16.msra.mxu1 %v4655_v21 }
 0x273   : > { %3779 = vmatprep.subr.bf16.mxu0 %v4666_v24  ;;  %3811 = vmatprep.subr.bf16.mxu1 %v4666_v24 }
 0x276   : > { %3781 = vmatpush3.bf16.msra.mxu0 %v4666_v24  ;;  %3813 = vmatpush3.bf16.msra.mxu1 %v4666_v24 }
 0x277   : > { %3783 = vmatprep.subr.bf16.mxu0 %v4674_v27  ;;  %3815 = vmatprep.subr.bf16.mxu1 %v4674_v27 }
 0x27a   : > { %3785 = vmatpush3.bf16.msra.mxu0 %v4674_v27  ;;  %3817 = vmatpush3.bf16.msra.mxu1 %v4674_v27 }
 0x27b   : > { %3787 = vmatprep.subr.bf16.mxu0 %v4682_v30  ;;  %3819 = vmatprep.subr.bf16.mxu1 %v4682_v30 }
 0x27e   : > { %3789 = vmatpush3.bf16.msra.mxu0 %v4682_v30  ;;  %3821 = vmatpush3.bf16.msra.mxu1 %v4682_v30 }
 0x27f   : > { %3791 = vmatprep.subr.bf16.mxu0 %v4690_v33  ;;  %3823 = vmatprep.subr.bf16.mxu1 %v4690_v33 }
 0x282   : > { %3793 = vmatpush3.bf16.msra.mxu0 %v4690_v33  ;;  %3825 = vmatpush3.bf16.msra.mxu1 %v4690_v33 }
 0x283   : > { %3795 = vmatprep.subr.bf16.mxu0 %v4698_v36  ;;  %3827 = vmatprep.subr.bf16.mxu1 %v4698_v36 }
 0x286   : > { %3797 = vmatpush3.bf16.msra.mxu0 %v4698_v36  ;;  %3829 = vmatpush3.bf16.msra.mxu1 %v4698_v36 }
 0x287   : > { %3799 = vmatprep.subr.bf16.mxu0 %v4706_v39  ;;  %3831 = vmatprep.subr.bf16.mxu1 %v4706_v39 }
 0x28a   : > { %3801 = vmatpush3.bf16.msra.mxu0 %v4706_v39  ;;  %3833 = vmatpush3.bf16.msra.mxu1 %v4706_v39 }
 0x28b   : > { %3835 = vmatprep.subr.bf16.mxu0 %v3834_v45  ;;  %3843 = vmatprep.subr.bf16.mxu1 %v3842_v49 }
 0x334   : > { %v3362_v54 = vpop.f32.mrb[6].mxu0  ;;  %v3397_v57 = vpop.f32.mrb[6].mxu1 }
 0x335   : > { %v1553_v56 = vmax.f32 %v3362_v54, 0.0  ;;  %v1455_v59 = vpop.f32.mrb[7].mxu0  ;;  %v1551_v60 = vsub.f32 %v1549_v53, %v3397_v57  ;;  %v1530_v47 = vpop.f32.mrb[7].mxu1 }
 0x336   : > { %v1552_v61 = vmax.f32 %v1455_v59, 0.0  ;;  %v1550_v62 = vsub.f32 %v1543_v55, %v1530_v47 }
 0x337   : > { %v1555_v42 = vmin.f32 %v1553_v56, 1.0  ;;  %2928 = vst [vmem:[%s4793_s9 + $0x18] sm:$0xff] %v1551_v60  ;;  %v1563_v46 = vadd.f32 %v3362_v54, %v1551_v60 }
 0x338   : > { %v1554_v63 = vmin.f32 %v1552_v61, 1.0  ;;  %2927 = vst [vmem:[%s4793_s9 + $0x10] sm:$0xff] %v1550_v62  ;;  %v1562_v0 = vadd.f32 %v1550_v62, %v1455_v59 }
 0x339   : > { %2926 = vst [vmem:[%s4796_s24 + $0x18] sm:$0xff] %v1555_v42  ;;  %v1565_v1 = vmax.f32 %v1563_v46, 0.0 }
 0x33a   : > { %2925 = vst [vmem:[%s4796_s24 + $0x10] sm:$0xff] %v1554_v63  ;;  %v1564_v3 = vmax.f32 %v1562_v0, 0.0 }
 0x33b   : > { %v1567_v4 = vmin.f32 %v1565_v1, 1.0 }
 0x33c   : > { %v1566_v6 = vmin.f32 %v1564_v3, 1.0 }
 0x33d   : > { %2930 = vst [vmem:[%s4801_s12 + $0x18] sm:$0xff] %v1567_v4 }
 0x33e   : > { %2929 = vst [vmem:[%s4801_s12 + $0x10] sm:$0xff] %v1566_v6 }
 0x340   : > { %v3411_v11 = vpop.f32.mrb[8].mxu0  ;;  %v3425_v15 = vpop.f32.mrb[8].mxu1 }
 0x341   : > { %v1724_v18 = vpop.f32.mrb[9].mxu0  ;;  %v1874_v2 = vpop.f32.mrb[9].mxu1 }
 0x342   : > { %3458 = vmatprep.mubr.f32.mxu0 %v1724_v18  ;;  %3493 = vmatprep.mubr.f32.mxu1 %v1874_v2 }
 0x343   : > { %3459 = vmatmul.mubr.f32.vlgmr.msra.gmra.mrb[10].mxu0 %v3411_v11  ;;  %3494 = vmatmul.mubr.f32.vlgmr.msra.gmra.mrb[10].mxu1 %v3425_v15 }
 0x344   : > { %3837 = vmatpush3.bf16.msra.mxu0 %v3834_v45  ;;  %3845 = vmatpush3.bf16.msra.mxu1 %v3842_v49 }
 0x345   : > { %3500 = vmatprep.mubr.msk.f32.mxu0 %vm584_vm0, %v4611_v5  ;;  %3514 = vmatprep.mubr.msk.f32.mxu1 %vm584_vm0, %v4611_v5  ;;  %v2036_v5 = vrot.slane %v4809_v28, 4 }
 0x346   : > { %3847 = vmatprep.subr.bf16.mxu1 %v3846_v7  ;;  %3839 = vmatprep.subr.bf16.mxu0 %v3838_v8 }
 0x347   : > { %3501 = vmatmul.mubr.msk.f32.vlgmr.msra.gmra.mrb[12].mxu0 %vm584_vm0, %v4628_v12  ;;  %3515 = vmatmul.mubr.msk.f32.vlgmr.msra.gmra.mrb[12].mxu1 %vm584_vm0, %v4628_v12  ;;  %v2041_v12 = vrot.slane %v4783_v58, 4 }
 0x348   : > { %3841 = vmatpush3.bf16.msra.mxu0 %v3838_v8  ;;  %3849 = vmatpush3.bf16.msra.mxu1 %v3846_v7 }
 0x349   : > { %3507 = vmatprep.mubr.msk.f32.mxu0 %vm584_vm0, %v4636_v16  ;;  %3521 = vmatprep.mubr.msk.f32.mxu1 %vm584_vm0, %v4636_v16  ;;  %v2035_v16 = vrot.slane %v4806_v26, 4 }
 0x34a   : > { %3851 = vmatprep.subr.bf16.mxu0 %v4638_v17  ;;  %3883 = vmatprep.subr.bf16.mxu1 %v4638_v17 }
 0x34f   : > { %3508 = vmatmul.mubr.msk.f32.vlgmr.msra.gmra.mrb[12].mxu0 %vm584_vm0, %v4653_v20  ;;  %3522 = vmatmul.mubr.msk.f32.vlgmr.msra.gmra.mrb[12].mxu1 %vm584_vm0, %v4653_v20 }
 0x350   : > { %3853 = vmatpush3.bf16.msra.mxu0 %v4638_v17  ;;  %3885 = vmatpush3.bf16.msra.mxu1 %v4638_v17  ;;  %v2043_v17 = vsel %vm1049_vm1, %v2036_v5, %v2041_v12 }
 0x351   : > { %3855 = vmatprep.subr.bf16.mxu0 %v4655_v21  ;;  %3887 = vmatprep.subr.bf16.mxu1 %v4655_v21 }
 0x354   : > { %3857 = vmatpush3.bf16.msra.mxu0 %v4655_v21  ;;  %3889 = vmatpush3.bf16.msra.mxu1 %v4655_v21  ;;  %v2037_v21 = vsel %vm1049_vm1, %v2035_v16, %v2036_v5 }
 0x355   : > { %3859 = vmatprep.subr.bf16.mxu0 %v4666_v24  ;;  %3891 = vmatprep.subr.bf16.mxu1 %v4666_v24 }
 0x358   : > { %3861 = vmatpush3.bf16.msra.mxu0 %v4666_v24  ;;  %3893 = vmatpush3.bf16.msra.mxu1 %v4666_v24 }
 0x359   : > { %3863 = vmatprep.subr.bf16.mxu0 %v4674_v27  ;;  %3895 = vmatprep.subr.bf16.mxu1 %v4674_v27 }
 0x35c   : > { %3865 = vmatpush3.bf16.msra.mxu0 %v4674_v27  ;;  %3897 = vmatpush3.bf16.msra.mxu1 %v4674_v27 }
 0x35d   : > { %3867 = vmatprep.subr.bf16.mxu0 %v4682_v30  ;;  %3899 = vmatprep.subr.bf16.mxu1 %v4682_v30 }
 0x360   : > { %3869 = vmatpush3.bf16.msra.mxu0 %v4682_v30  ;;  %3901 = vmatpush3.bf16.msra.mxu1 %v4682_v30 }
 0x361   : > { %3871 = vmatprep.subr.bf16.mxu0 %v4690_v33  ;;  %3903 = vmatprep.subr.bf16.mxu1 %v4690_v33 }
 0x364   : > { %3873 = vmatpush3.bf16.msra.mxu0 %v4690_v33  ;;  %3905 = vmatpush3.bf16.msra.mxu1 %v4690_v33 }
 0x365   : > { %3875 = vmatprep.subr.bf16.mxu0 %v4698_v36  ;;  %3907 = vmatprep.subr.bf16.mxu1 %v4698_v36 }
 0x368   : > { %3877 = vmatpush3.bf16.msra.mxu0 %v4698_v36  ;;  %3909 = vmatpush3.bf16.msra.mxu1 %v4698_v36 }
 0x369   : > { %3879 = vmatprep.subr.bf16.mxu0 %v4706_v39  ;;  %3911 = vmatprep.subr.bf16.mxu1 %v4706_v39 }
 0x36c   : > { %3881 = vmatpush3.bf16.msra.mxu0 %v4706_v39  ;;  %3913 = vmatpush3.bf16.msra.mxu1 %v4706_v39 }
 0x416   : > { %v3460_v20 = vpop.f32.mrb[10].mxu0  ;;  %v3495_v27 = vpop.f32.mrb[10].mxu1 }
 0x417   : > { %v2047_v24 = vmax.f32 %v3460_v20, 0.0  ;;  %v1949_v30 = vpop.f32.mrb[11].mxu0  ;;  %v2045_v33 = vsub.f32 %v2043_v17, %v3495_v27  ;;  %v2024_v39 = vpop.f32.mrb[11].mxu1 }
 0x418   : > { %v2046_v36 = vmax.f32 %v1949_v30, 0.0  ;;  %v2044_v58 = vsub.f32 %v2037_v21, %v2024_v39 }
 0x419   : > { %v2049_v19 = vmin.f32 %v2047_v24, 1.0  ;;  %2950 = vst [vmem:[%s4793_s9 + $0x28] sm:$0xff] %v2045_v33  ;;  %v2057_v22 = vadd.f32 %v3460_v20, %v2045_v33 }
 0x41a   : > { %v2048_v23 = vmin.f32 %v2046_v36, 1.0  ;;  %2949 = vst [vmem:[%s4793_s9 + $0x20] sm:$0xff] %v2044_v58  ;;  %v2056_v25 = vadd.f32 %v2044_v58, %v1949_v30 }
 0x41b   : > { %2948 = vst [vmem:[%s4796_s24 + $0x28] sm:$0xff] %v2049_v19  ;;  %v2059_v26 = vmax.f32 %v2057_v22, 0.0 }
 0x41c   : > { %2947 = vst [vmem:[%s4796_s24 + $0x20] sm:$0xff] %v2048_v23  ;;  %v2058_v28 = vmax.f32 %v2056_v25, 0.0 }
 0x41d   : > { %v2061_v29 = vmin.f32 %v2059_v26, 1.0 }
 0x41e   : > { %v2060_v31 = vmin.f32 %v2058_v28, 1.0 }
 0x41f   : > { %2952 = vst [vmem:[%s4801_s12 + $0x28] sm:$0xff] %v2061_v29 }
 0x420   : > { %2951 = vst [vmem:[%s4801_s12 + $0x20] sm:$0xff] %v2060_v31 }
 0x422   : > { %v3509_v32 = vpop.f32.mrb[12].mxu0  ;;  %v3523_v34 = vpop.f32.mrb[12].mxu1 }
 0x423   : > { %v2218_v35 = vpop.f32.mrb[13].mxu0  ;;  %v2368_v37 = vpop.f32.mrb[13].mxu1 }
 0x424   : > { %3556 = vmatprep.mubr.f32.mxu0 %v2218_v35  ;;  %3591 = vmatprep.mubr.f32.mxu1 %v2368_v37 }
 0x425   : > { %3557 = vmatmul.mubr.f32.vlgmr.msra.gmra.mrb[14].mxu0 %v3509_v32  ;;  %3592 = vmatmul.mubr.f32.vlgmr.msra.gmra.mrb[14].mxu1 %v3523_v34 }
 0x4f8   : > { %v3558_v45 = vpop.f32.mrb[14].mxu0  ;;  %v3593_v49 = vpop.f32.mrb[14].mxu1 }
 0x4f9   : > { %v2541_v44 = vmax.f32 %v3558_v45, 0.0  ;;  %v2443_v50 = vpop.f32.mrb[15].mxu0  ;;  %v2539_v51 = vsub.f32 %v2537_v43, %v3593_v49  ;;  %v2518_v53 = vpop.f32.mrb[15].mxu1 }
 0x4fa   : > { %v2540_v52 = vmax.f32 %v2443_v50, 0.0  ;;  %v2538_v55 = vsub.f32 %v2531_v48, %v2518_v53 }
 0x4fb   : > { %v2543_v54 = vmin.f32 %v2541_v44, 1.0  ;;  %2972 = vst [vmem:[%s4793_s9 + $0x38] sm:$0xff] %v2539_v51  ;;  %v4971_v56 = vadd.f32 %v3558_v45, %v2539_v51 }
 0x4fc   : > { %v2542_v57 = vmin.f32 %v2540_v52, 1.0  ;;  %2971 = vst [vmem:[%s4793_s9 + $0x30] sm:$0xff] %v2538_v55  ;;  %v2550_v59 = vadd.f32 %v2538_v55, %v2443_v50 }
 0x4fd   : > { %2970 = vst [vmem:[%s4796_s24 + $0x38] sm:$0xff] %v2543_v54  ;;  %v2553_v60 = vmax.f32 %v4971_v56, 0.0 }
 0x4fe   : > { %2969 = vst [vmem:[%s4796_s24 + $0x30] sm:$0xff] %v2542_v57 }
 0x4ff   : > { %4132 = shalt.err (!%p4129_p12)
}
 0x500   : > { %s4133_s9 = scalar_lea.hbm %s4968_s10, 1024  ;;  %s4137_s11 = scalar_lea.hbm %s5107_s6, 2048 }
 0x501   : > { %p4134_p6 = scmp.ne.s32.totalorder %s4968_s10, %s4133_s9  ;;  %p4138_p7 = scmp.lt.u32.totalorder %s4968_s10, %s5107_s6 }
 0x502   : > { %p4139_p0 = scmp.lt.u32.totalorder %s4137_s11, %s4133_s9  ;;  %p4141_p4 = scmp.lt.u32.totalorder %s4133_s9, %s4968_s10 }
 0x503   : > { %p4135_p10 = pnand %p4134_p6, %p5127_p8 }
 0x504   : > { %p4140_p2 = por %p4139_p0, %p4138_p7 }
 0x505   : > { %p4136_p13 = pneg %p4135_p10 }
 0x506   : > { %p4142_p3 = por %p4141_p4, %p4140_p2 }
 0x508   : > { %p4143_p9 = pnand %p4142_p3, %p4136_p13 }
 0x50a   : > { %4146 = shalt.err (!%p4143_p9)
}
 0x50b   : > { %s4289_s26 = smov 128   ;;  %s4290_s19 = smov 8   ;;  %v2552_v61 = vmax.f32 %v2550_v59, 0.0 }
 0x50c   : > { %3955 = dma.vmem_to_hbm [thread:$0]  (%p5127_p8), %s4962_s20, 1024, %s4968_s10, %s2565_s17, %s4289_s26, %s4289_s26, %s4290_s19  }
 0x50d   : > { %s2560_s30 = scalar_lea.sflag [#allocation4], %s4573_s22  ;;  %s4147_s13 = scalar_lea.vmem %s4960_s15, 1024 }
 0x50e   : > { %p4148_p11 = scmp.ne.s32.totalorder %s4960_s15, %s4147_s13  ;;  %s4291_s9 = smov [#allocation11]  }
 0x50f   : > { %s4151_s24 = sshll.u32 %s4291_s9, 4  ;;  %s4152_s24 = int_to_ptr.vmem [resolvable:$false] %s4151_s24 }
 0x510   : > { %p4149_p1 = pnand %p4148_p11, %p5127_p8  ;;  %s4153_s27 = scalar_lea.vmem %s4152_s24, 2048 }
 0x511   : > { %p4154_p12 = scmp.lt.s32.totalorder %s4960_s15, %s4152_s24  ;;  %p4155_p6 = scmp.lt.s32.totalorder %s4153_s27, %s4147_s13 }
 0x512   : > { %p4150_p5 = pneg %p4149_p1 }
 0x513   : > { %p4156_p10 = por %p4155_p6, %p4154_p12 }
 0x515   : > { %p4157_p13 = pnand %p4156_p10, %p4150_p5 }
 0x517   : > { %4160 = shalt.err (!%p4157_p13)
}
 0x518   : > { %s4161_s20 = scalar_lea.hbm %s4977_s21, 1024  ;;  %s4165_s8 = scalar_lea.hbm %s5106_s5, 2048 }
 0x519   : > { %p4162_p7 = scmp.ne.s32.totalorder %s4977_s21, %s4161_s20  ;;  %p4166_p4 = scmp.lt.u32.totalorder %s4977_s21, %s5106_s5 }
 0x51a   : > { %p4167_p3 = scmp.lt.u32.totalorder %s4165_s8, %s4161_s20  ;;  %p4169_p11 = scmp.lt.u32.totalorder %s4161_s20, %s4977_s21 }
 0x51b   : > { %p4163_p0 = pnand %p4162_p7, %p5127_p8 }
 0x51c   : > { %p4168_p9 = por %p4167_p3, %p4166_p4 }
 0x51d   : > { %p4164_p2 = pneg %p4163_p0 }
 0x51e   : > { %p4170_p1 = por %p4169_p11, %p4168_p9 }
 0x520   : > { %p4171_p5 = pnand %p4170_p1, %p4164_p2 }
 0x522   : > { %4174 = shalt.err (!%p4171_p5)
}
 0x523   : > { %3954 = dma.vmem_to_hbm [thread:$0]  (%p5127_p8), %s4960_s15, 1024, %s4977_s21, %s2560_s30, %s4289_s26, %s4289_s26, %s4290_s19   ;;  %v2555_v47 = vmin.f32 %v2553_v60, 1.0  ;;  %v2554_v42 = vmin.f32 %v2552_v61, 1.0 }
 0x524   : > { %s5046_s22 = scalar_lea.hbm %s5108_s7, %s4958_s16  ;;  %s4175_s27 = scalar_lea.vmem %s5040_s0, 1024 }
 0x525   : > { %2974 = vst [vmem:[%s4801_s12 + $0x38] sm:$0xff] %v2555_v47  ;;  %2973 = vst [vmem:[%s4801_s12 + $0x30] sm:$0xff] %v2554_v42  ;;  %p4176_p12 = scmp.ne.s32.totalorder %s5040_s0, %s4175_s27  ;;  %s4292_s15 = smov [#allocation14]  }
 0x526   : > { %s4179_s21 = sshll.u32 %s4292_s15, 4  ;;  %s4180_s21 = int_to_ptr.vmem [resolvable:$false] %s4179_s21 }
 0x527   : > { %p4177_p6 = pnand %p4176_p12, %p5127_p8  ;;  %s4181_s30 = scalar_lea.vmem %s4180_s21, 2048 }
 0x528   : > { %p4182_p13 = scmp.lt.s32.totalorder %s5040_s0, %s4180_s21  ;;  %p4183_p7 = scmp.lt.s32.totalorder %s4181_s30, %s4175_s27 }
 0x529   : > { %p4178_p10 = pneg %p4177_p6 }
 0x52a   : > { %p4184_p0 = por %p4183_p7, %p4182_p13 }
 0x52c   : > { %p4185_p2 = pnand %p4184_p0, %p4178_p10 }
 0x52e   : > { %4188 = shalt.err (!%p4185_p2)
}
 0x52f   : > { %s4189_s12 = scalar_lea.hbm %s5046_s22, 1024  ;;  %s4193_s10 = scalar_lea.hbm %s5108_s7, 2048 }
 0x530   : > { %p4190_p4 = scmp.ne.s32.totalorder %s5046_s22, %s4189_s12  ;;  %p4194_p11 = scmp.lt.u32.totalorder %s5046_s22, %s5108_s7 }
 0x531   : > { %p4195_p1 = scmp.lt.u32.totalorder %s4193_s10, %s4189_s12  ;;  %p4197_p12 = scmp.lt.u32.totalorder %s4189_s12, %s5046_s22 }
 0x532   : > { %p4191_p3 = pnand %p4190_p4, %p5127_p8 }
 0x533   : > { %p4196_p5 = por %p4195_p1, %p4194_p11 }
 0x534   : > { %p4192_p9 = pneg %p4191_p3 }
 0x535   : > { %p4198_p6 = por %p4197_p12, %p4196_p5 }
 0x537   : > { %p4199_p10 = pnand %p4198_p6, %p4192_p9 }
 0x539   : > { %4202 = shalt.err (!%p4199_p10)
}
 0x53a   : > { %3956 = dma.vmem_to_hbm [thread:$0]  (%p5127_p8), %s5040_s0, 1024, %s5046_s22, %s2565_s17, %s4289_s26, %s4289_s26, %s4290_s19  }
 0x53b PF: > { %s5128_s23 = sld [smem:[#allocation26_spill]]  ;;  %s5129_s9 = sld [smem:[#allocation30_spill]] }
 0x53c   : > { %p5131_p7 = scmp.ge.s32.totalorder %s4269_s29, 2 }
 0x541   : > { %s2636_s13 = sand.u32 1, %s5128_s23   ;;  %p5130_p13 = scmp.ne.s32.totalorder %s5129_s9, 0 }
 0x542   : > { %s2637_s24 = scalar_lea.sflag [#allocation4], %s2636_s13 }
 0x543   : > { %p3961_p0 = pnand %p5131_p7, %p5130_p13 }
 0x545   : > { %4240 = dma.done.wait (!%p3961_p0), %s2637_s24, 1024  }
 0x546   : > { %4242 = vsyncadd (!%p3961_p0), %s2637_s24, 4294966272  ;;  %s5132_s14 = sadd.s32 4294967294, %s4269_s29  }
 0x547   : > { %s2645_s27 = sand.u32 1, %s5132_s14  }
 0x548   : > { %s2646_s15 = scalar_lea.sflag [#allocation13], %s2645_s27 }
 0x549   : > { %4244 = dma.done.wait (!%p3961_p0), %s2646_s15, 2048  }
 0x54a   : > { %4246 = vsyncadd (!%p3961_p0), %s2646_s15, 4294965248  ;;  %s33_s29 = sadd.s32 1, %s4269_s29   ;;  %s5133_s18 = sld [smem:[#allocation27_spill]] }
 0x54b   : > { %p30_p8 = scmp.ge.s32.totalorder %s33_s29, 4   ;;  %s5134_s26 = sld [smem:[#allocation29_spill]] }
 0x54c   : > { %s5135_s0 = sld [smem:[#allocation28_spill]]  ;;  %s5136_s24 = smov %s4253_s25 }
 0x54d   : > { %s5138_s27 = smov %s4265_s28  ;;  %32 = sbr.rel (!%p30_p8) target bundleno = 14 (0xe), region = 198 }
 0x550   : > { %s5137_s25 = smov %s5133_s18 }
 0x552   : > { %s5139_s28 = smov %s5135_s0 }
 0x554   :  { %2660 = vsyncpa [#allocation3], 1 }
 0x555   :  { %2662 = vsyncpa [#allocation3 + $0x1], 1 }
 0x556   :  { %2663 = vsyncpa [#allocation6], 1 }
 0x557   :  { %2665 = vsyncpa [#allocation6 + $0x1], 1 }
 0x558   :  { %2666 = vsyncpa [#allocation9], 1 }
 0x559   :  { %2668 = vsyncpa [#allocation9 + $0x1], 1 }
 0x55a   :  { %2669 = vsyncpa [#allocation4], 1 }
 0x55b   :  { %2671 = vsyncpa [#allocation4 + $0x1], 1 }
 0x55c   :  { %2672 = vsyncpa [#allocation13], 1 }
 0x55d   :  { %2674 = vsyncpa [#allocation13 + $0x1], 1 }

</bundles_post_ra>
